<compile_context>
chip_gen: v5e
topology: v5e:2x2
jax: 0.10.0
libtpu: 0.0.40
codegen_flags: <defaults>
</compile_context>

<pallas_src>
import math
from functools import partial

import jax
import jax.numpy as jnp
from jax import lax
from jax.experimental import pallas as pl
from jax.experimental.pallas import tpu as pltpu


def _mha_kernel(q_ref, k_ref, v_ref, mask_ref,
                wq_ref, bq_ref, wk_ref, bk_ref, wv_ref, bv_ref, wo_ref, bo_ref,
                out_ref, scores_ref, *, nheads, d_k):
    # PyTorch nn.Linear weight layout is (out_features, in_features); contract
    # activation last dim with weight last dim -> y = x @ W^T (no transpose).
    dn = (((1,), (1,)), ((), ()))

    xq = q_ref[0]              # (S, D)
    xk = k_ref[0]              # (S, D)
    xv = v_ref[0]              # (S, D)
    mask = mask_ref[0]         # (S, S) int32, 0 == masked

    q_proj = lax.dot_general(xq, wq_ref[...], dn,
                             preferred_element_type=jnp.float32) + bq_ref[...]
    k_proj = lax.dot_general(xk, wk_ref[...], dn,
                             preferred_element_type=jnp.float32) + bk_ref[...]
    v_proj = lax.dot_general(xv, wv_ref[...], dn,
                             preferred_element_type=jnp.float32) + bv_ref[...]

    scale = jnp.float32(1.0 / math.sqrt(d_k))
    neg_big = jnp.float32(-1e9)
    masked = (mask == 0)

    # fp32 accumulator for the output projection; per-head partial products of
    # ctx_h @ W_o[:, head_cols]^T are summed here (avoids a lane-axis concat).
    out_acc = jnp.zeros(q_proj.shape, jnp.float32)     # (S, D)

    for h in range(nheads):                            # static, unrolled
        lo = h * d_k
        qh = q_proj[:, lo:lo + d_k]                    # (S, d_k)
        kh = k_proj[:, lo:lo + d_k]                    # (S, d_k)
        vh = v_proj[:, lo:lo + d_k]                    # (S, d_k)

        # scores = Qh @ Kh^T / sqrt(d_k)
        s = lax.dot_general(qh, kh, dn,
                            preferred_element_type=jnp.float32) * scale  # (S, S)
        s = jnp.where(masked, neg_big, s)

        # numerically-stable softmax over the key axis
        m = jnp.max(s, axis=-1, keepdims=True)
        p = jnp.exp(s - m)
        l = jnp.sum(p, axis=-1, keepdims=True)
        p = p / l
        # TODO(synk): training-mode attention dropout not implemented
        # (eval-mode identity; module's nn.Dropout applied after softmax).
        scores_ref[0, h] = p

        ctx_h = jnp.dot(p, vh, preferred_element_type=jnp.float32)      # (S, d_k)

        # output-projection contribution of this head:
        # out += ctx_h @ W_o[:, lo:lo+d_k]^T
        wo_h = wo_ref[:, lo:lo + d_k]                                    # (D, d_k)
        out_acc = out_acc + lax.dot_general(ctx_h, wo_h, dn,
                                            preferred_element_type=jnp.float32)

    out_ref[0] = (out_acc + bo_ref[...]).astype(out_ref.dtype)


def multi_head_attention_block(q, k, v, mask,
                               wq, bq, wk, bk, wv, bv, wo, bo,
                               *, nheads):
    """Forward pass of MutliHeadAttentionBlock.

    q, k, v : (B, S, d_model)
    mask    : (B, S, S) int32; 0 => masked (filled with -1e9 before softmax)
    w_*     : (d_model, d_model)  -- PyTorch nn.Linear layout (out, in)
    b_*     : (d_model,)
    returns (out, attention_scores) with shapes (B, S, d_model), (B, H, S, S)
    """
    B, S, D = q.shape
    assert D % nheads == 0, "d_model must be divisible by nheads"
    d_k = D // nheads
    H = nheads

    bq2 = bq.reshape(1, D)
    bk2 = bk.reshape(1, D)
    bv2 = bv.reshape(1, D)
    bo2 = bo.reshape(1, D)

    kernel = partial(_mha_kernel, nheads=H, d_k=d_k)

    qkv_spec = pl.BlockSpec((1, S, D), lambda b: (b, 0, 0))
    mask_spec = pl.BlockSpec((1, S, S), lambda b: (b, 0, 0))
    w_spec = pl.BlockSpec((D, D), lambda b: (0, 0))     # weights stay resident
    b_spec = pl.BlockSpec((1, D), lambda b: (0, 0))

    flops = B * (8 * S * D * D + 4 * S * S * D)          # 4 projections + attn
    transcendentals = B * H * S * S                       # exp in softmax
    bytes_accessed = 4 * (3 * B * S * D + B * S * S + 4 * D * D + 4 * D
                          + B * S * D + B * H * S * S)

    out, scores = pl.pallas_call(
        kernel,
        out_shape=(jax.ShapeDtypeStruct((B, S, D), q.dtype),
                   jax.ShapeDtypeStruct((B, H, S, S), jnp.float32)),
        grid=(B,),
        in_specs=[qkv_spec, qkv_spec, qkv_spec, mask_spec,
                  w_spec, b_spec,    # w_q, b_q
                  w_spec, b_spec,    # w_k, b_k
                  w_spec, b_spec,    # w_v, b_v
                  w_spec, b_spec],   # w_o, b_o
        out_specs=[pl.BlockSpec((1, S, D), lambda b: (b, 0, 0)),
                   pl.BlockSpec((1, H, S, S), lambda b: (b, 0, 0, 0))],
        compiler_params=pltpu.CompilerParams(
            dimension_semantics=("parallel",)),
        cost_estimate=pl.CostEstimate(flops=flops,
                                      transcendentals=transcendentals,
                                      bytes_accessed=bytes_accessed),
    )(q, k, v, mask, wq, bq2, wk, bk2, wv, bv2, wo, bo2)
    return out, scores


if __name__ == "__main__":
    # Small but lane-dense config: d_model = 128 (full lane width), 4 heads.
    batch, seq, d_model, nheads = 2, 16, 128, 4
    d_k = d_model // nheads

    key = jax.random.PRNGKey(0)
    keys = jax.random.split(key, 11)
    bound = 1.0 / math.sqrt(d_model)

    def init_linear(kw, kb):
        w = jax.random.uniform(kw, (d_model, d_model), jnp.float32,
                               minval=-bound, maxval=bound)
        b = jax.random.uniform(kb, (d_model,), jnp.float32,
                               minval=-bound, maxval=bound)
        return w, b

    wq, bq = init_linear(keys[0], keys[1])
    wk, bk = init_linear(keys[2], keys[3])
    wv, bv = init_linear(keys[4], keys[5])
    wo, bo = init_linear(keys[6], keys[7])

    q = jax.random.normal(keys[8], (batch, seq, d_model), jnp.float32)
    k = jax.random.normal(keys[9], (batch, seq, d_model), jnp.float32)
    v = jax.random.normal(keys[10], (batch, seq, d_model), jnp.float32)

    # Causal mask (1 = keep, 0 = masked), broadcast over batch.
    causal = jnp.tril(jnp.ones((seq, seq), jnp.int32))
    mask = jnp.broadcast_to(causal, (batch, seq, seq))

    out, scores = multi_head_attention_block(
        q, k, v, mask, wq, bq, wk, bk, wv, bv, wo, bo, nheads=nheads)
    jax.block_until_ready((out, scores))

    # ---- plain-JAX reference (same math as the PyTorch module, eval mode) ----
    def linear(x, w, b):
        return x @ w.T + b

    def split_heads(x):
        return x.reshape(batch, seq, nheads, d_k).transpose(0, 2, 1, 3)

    Qr = split_heads(linear(q, wq, bq))
    Kr = split_heads(linear(k, wk, bk))
    Vr = split_heads(linear(v, wv, bv))
    s_ref = (Qr @ jnp.swapaxes(Kr, -2, -1)) / math.sqrt(d_k)
    s_ref = jnp.where(mask[:, None, :, :] == 0, -1e9, s_ref)
    p_ref = jax.nn.softmax(s_ref, axis=-1)
    ctx = (p_ref @ Vr).transpose(0, 2, 1, 3).reshape(batch, seq, d_model)
    out_ref_val = linear(ctx, wo, bo)

    assert out.shape == (batch, seq, d_model)
    assert scores.shape == (batch, nheads, seq, seq)
    assert jnp.allclose(out, out_ref_val, atol=1e-4, rtol=1e-4)
    assert jnp.allclose(scores, p_ref, atol=1e-5, rtol=1e-5)

    print("KERNEL_OK")
</pallas_src>

<mosaic_0001>
module attributes {stable_mosaic.version = 11 : i64} {
  func.func @_mha_kernel(%arg0: i32, %arg1: memref<1x16x128xf32, #tpu.memory_space<vmem>>, %arg2: memref<1x16x128xf32, #tpu.memory_space<vmem>>, %arg3: memref<1x16x128xf32, #tpu.memory_space<vmem>>, %arg4: memref<1x16x16xi32, #tpu.memory_space<vmem>>, %arg5: memref<128x128xf32, #tpu.memory_space<vmem>>, %arg6: memref<1x128xf32, #tpu.memory_space<vmem>>, %arg7: memref<128x128xf32, #tpu.memory_space<vmem>>, %arg8: memref<1x128xf32, #tpu.memory_space<vmem>>, %arg9: memref<128x128xf32, #tpu.memory_space<vmem>>, %arg10: memref<1x128xf32, #tpu.memory_space<vmem>>, %arg11: memref<128x128xf32, #tpu.memory_space<vmem>>, %arg12: memref<1x128xf32, #tpu.memory_space<vmem>>, %arg13: memref<1x16x128xf32, #tpu.memory_space<vmem>>, %arg14: memref<1x4x16x16xf32, #tpu.memory_space<vmem>>) attributes {dimension_semantics = [#tpu.dimension_semantics<parallel>], iteration_bounds = array<i64: 2>, scalar_prefetch = 0 : i64, scratch_operands = 0 : i64, tpu.core_type = #tpu.core_type<tc>, window_params = [{transform_indices = @transform_0, window_bounds = array<i64: 1, 16, 128>}, {transform_indices = @transform_1, window_bounds = array<i64: 1, 16, 128>}, {transform_indices = @transform_2, window_bounds = array<i64: 1, 16, 128>}, {transform_indices = @transform_3, window_bounds = array<i64: 1, 16, 16>}, {pipeline_mode = #tpu.pipeline_mode<synchronous>, transform_indices = @transform_4, window_bounds = array<i64: 128, 128>}, {pipeline_mode = #tpu.pipeline_mode<synchronous>, transform_indices = @transform_5, window_bounds = array<i64: 1, 128>}, {pipeline_mode = #tpu.pipeline_mode<synchronous>, transform_indices = @transform_6, window_bounds = array<i64: 128, 128>}, {pipeline_mode = #tpu.pipeline_mode<synchronous>, transform_indices = @transform_7, window_bounds = array<i64: 1, 128>}, {pipeline_mode = #tpu.pipeline_mode<synchronous>, transform_indices = @transform_8, window_bounds = array<i64: 128, 128>}, {pipeline_mode = #tpu.pipeline_mode<synchronous>, transform_indices = @transform_9, window_bounds = array<i64: 1, 128>}, {pipeline_mode = #tpu.pipeline_mode<synchronous>, transform_indices = @transform_10, window_bounds = array<i64: 128, 128>}, {pipeline_mode = #tpu.pipeline_mode<synchronous>, transform_indices = @transform_11, window_bounds = array<i64: 1, 128>}, {transform_indices = @transform_12, window_bounds = array<i64: 1, 16, 128>}, {transform_indices = @transform_13, window_bounds = array<i64: 1, 4, 16, 16>}]} {
    %c0 = arith.constant 0 : index
    %c0_0 = arith.constant 0 : index
    %c0_1 = arith.constant 0 : index
    %0 = vector.load %arg1[%c0, %c0_0, %c0_1] : memref<1x16x128xf32, #tpu.memory_space<vmem>>, vector<1x16x128xf32>
    %1 = vector.shape_cast %0 : vector<1x16x128xf32> to vector<16x128xf32>
    %c0_2 = arith.constant 0 : index
    %c0_3 = arith.constant 0 : index
    %c0_4 = arith.constant 0 : index
    %2 = vector.load %arg2[%c0_2, %c0_3, %c0_4] : memref<1x16x128xf32, #tpu.memory_space<vmem>>, vector<1x16x128xf32>
    %3 = vector.shape_cast %2 : vector<1x16x128xf32> to vector<16x128xf32>
    %c0_5 = arith.constant 0 : index
    %c0_6 = arith.constant 0 : index
    %c0_7 = arith.constant 0 : index
    %4 = vector.load %arg3[%c0_5, %c0_6, %c0_7] : memref<1x16x128xf32, #tpu.memory_space<vmem>>, vector<1x16x128xf32>
    %5 = vector.shape_cast %4 : vector<1x16x128xf32> to vector<16x128xf32>
    %c0_8 = arith.constant 0 : index
    %c0_9 = arith.constant 0 : index
    %c0_10 = arith.constant 0 : index
    %6 = vector.load %arg4[%c0_8, %c0_9, %c0_10] : memref<1x16x16xi32, #tpu.memory_space<vmem>>, vector<1x16x16xi32>
    %7 = vector.shape_cast %6 : vector<1x16x16xi32> to vector<16x16xi32>
    %c0_11 = arith.constant 0 : index
    %c0_12 = arith.constant 0 : index
    %8 = vector.load %arg5[%c0_11, %c0_12] : memref<128x128xf32, #tpu.memory_space<vmem>>, vector<128x128xf32>
    %cst = arith.constant dense<0.000000e+00> : vector<16x128xf32>
    %9 = tpu.matmul %1, %8, %cst {dimension_numbers = #tpu.dot_dimension_numbers<[1], [1], [0], [0], [0, 0, 1, 0], [], []>} : vector<16x128xf32>, vector<128x128xf32>, vector<16x128xf32> -> vector<16x128xf32>
    %c0_13 = arith.constant 0 : index
    %c0_14 = arith.constant 0 : index
    %10 = vector.load %arg6[%c0_13, %c0_14] : memref<1x128xf32, #tpu.memory_space<vmem>>, vector<1x128xf32>
    %11 = vector.broadcast %10 : vector<1x128xf32> to vector<16x128xf32>
    %12 = arith.addf %9, %11 : vector<16x128xf32>
    %c0_15 = arith.constant 0 : index
    %c0_16 = arith.constant 0 : index
    %13 = vector.load %arg7[%c0_15, %c0_16] : memref<128x128xf32, #tpu.memory_space<vmem>>, vector<128x128xf32>
    %cst_17 = arith.constant dense<0.000000e+00> : vector<16x128xf32>
    %14 = tpu.matmul %3, %13, %cst_17 {dimension_numbers = #tpu.dot_dimension_numbers<[1], [1], [0], [0], [0, 0, 1, 0], [], []>} : vector<16x128xf32>, vector<128x128xf32>, vector<16x128xf32> -> vector<16x128xf32>
    %c0_18 = arith.constant 0 : index
    %c0_19 = arith.constant 0 : index
    %15 = vector.load %arg8[%c0_18, %c0_19] : memref<1x128xf32, #tpu.memory_space<vmem>>, vector<1x128xf32>
    %16 = vector.broadcast %15 : vector<1x128xf32> to vector<16x128xf32>
    %17 = arith.addf %14, %16 : vector<16x128xf32>
    %c0_20 = arith.constant 0 : index
    %c0_21 = arith.constant 0 : index
    %18 = vector.load %arg9[%c0_20, %c0_21] : memref<128x128xf32, #tpu.memory_space<vmem>>, vector<128x128xf32>
    %cst_22 = arith.constant dense<0.000000e+00> : vector<16x128xf32>
    %19 = tpu.matmul %5, %18, %cst_22 {dimension_numbers = #tpu.dot_dimension_numbers<[1], [1], [0], [0], [0, 0, 1, 0], [], []>} : vector<16x128xf32>, vector<128x128xf32>, vector<16x128xf32> -> vector<16x128xf32>
    %c0_23 = arith.constant 0 : index
    %c0_24 = arith.constant 0 : index
    %20 = vector.load %arg10[%c0_23, %c0_24] : memref<1x128xf32, #tpu.memory_space<vmem>>, vector<1x128xf32>
    %21 = vector.broadcast %20 : vector<1x128xf32> to vector<16x128xf32>
    %22 = arith.addf %19, %21 : vector<16x128xf32>
    %c0_i32 = arith.constant 0 : i32
    %23 = vector.broadcast %c0_i32 : i32 to vector<16x16xi32>
    %24 = arith.cmpi eq, %7, %23 : vector<16x16xi32>
    %cst_25 = arith.constant 0.000000e+00 : f32
    %25 = vector.broadcast %cst_25 : f32 to vector<16x128xf32>
    %26 = vector.extract_strided_slice %12 {offsets = [0, 0], sizes = [16, 32], strides = [1, 1]} : vector<16x128xf32> to vector<16x32xf32>
    %27 = vector.extract_strided_slice %17 {offsets = [0, 0], sizes = [16, 32], strides = [1, 1]} : vector<16x128xf32> to vector<16x32xf32>
    %28 = vector.extract_strided_slice %22 {offsets = [0, 0], sizes = [16, 32], strides = [1, 1]} : vector<16x128xf32> to vector<16x32xf32>
    %cst_26 = arith.constant dense<0.000000e+00> : vector<16x16xf32>
    %29 = tpu.matmul %26, %27, %cst_26 {dimension_numbers = #tpu.dot_dimension_numbers<[1], [1], [0], [0], [0, 0, 1, 0], [], []>} : vector<16x32xf32>, vector<16x32xf32>, vector<16x16xf32> -> vector<16x16xf32>
    %cst_27 = arith.constant 0.176776692 : f32
    %30 = vector.broadcast %cst_27 : f32 to vector<16x16xf32>
    %31 = arith.mulf %29, %30 : vector<16x16xf32>
    %cst_28 = arith.constant -1.000000e+09 : f32
    %32 = vector.broadcast %cst_28 : f32 to vector<16x16xf32>
    %33 = arith.select %24, %32, %31 : vector<16x16xi1>, vector<16x16xf32>
    %cst_29 = arith.constant dense<0xFF800000> : vector<16xf32>
    %34 = vector.multi_reduction <maximumf>, %33, %cst_29 [1] : vector<16x16xf32> to vector<16xf32>
    %35 = vector.shape_cast %34 : vector<16xf32> to vector<16x1xf32>
    %36 = vector.broadcast %35 : vector<16x1xf32> to vector<16x16xf32>
    %37 = arith.subf %33, %36 : vector<16x16xf32>
    %38 = math.exp %37 : vector<16x16xf32>
    %cst_30 = arith.constant dense<0.000000e+00> : vector<16xf32>
    %39 = vector.multi_reduction <add>, %38, %cst_30 [1] : vector<16x16xf32> to vector<16xf32>
    %40 = vector.shape_cast %39 : vector<16xf32> to vector<16x1xf32>
    %41 = vector.broadcast %40 : vector<16x1xf32> to vector<16x16xf32>
    %42 = arith.divf %38, %41 : vector<16x16xf32>
    %c0_31 = arith.constant 0 : index
    %c0_32 = arith.constant 0 : index
    %c0_33 = arith.constant 0 : index
    %c0_34 = arith.constant 0 : index
    %43 = vector.load %arg14[%c0_31, %c0_32, %c0_33, %c0_34] : memref<1x4x16x16xf32, #tpu.memory_space<vmem>>, vector<1x1x16x16xf32>
    %44 = vector.shape_cast %43 : vector<1x1x16x16xf32> to vector<16x16xf32>
    %45 = vector.shape_cast %42 : vector<16x16xf32> to vector<1x1x16x16xf32>
    tpu.vector_store %arg14[%c0_31, %c0_32, %c0_33, %c0_34], %45 {strides = array<i32>} : memref<1x4x16x16xf32, #tpu.memory_space<vmem>>, vector<1x1x16x16xf32>,
    %cst_35 = arith.constant dense<0.000000e+00> : vector<16x32xf32>
    %46 = tpu.matmul %42, %28, %cst_35 {dimension_numbers = #tpu.dot_dimension_numbers<[1], [0], [0], [1], [0, 0, 1, 1], [], []>} : vector<16x16xf32>, vector<16x32xf32>, vector<16x32xf32> -> vector<16x32xf32>
    %c0_36 = arith.constant 0 : index
    %c0_37 = arith.constant 0 : index
    %47 = vector.load %arg11[%c0_36, %c0_37] : memref<128x128xf32, #tpu.memory_space<vmem>>, vector<128x32xf32>
    %cst_38 = arith.constant dense<0.000000e+00> : vector<16x128xf32>
    %48 = tpu.matmul %46, %47, %cst_38 {dimension_numbers = #tpu.dot_dimension_numbers<[1], [1], [0], [0], [0, 0, 1, 0], [], []>} : vector<16x32xf32>, vector<128x32xf32>, vector<16x128xf32> -> vector<16x128xf32>
    %49 = arith.addf %25, %48 : vector<16x128xf32>
    %50 = vector.extract_strided_slice %12 {offsets = [0, 32], sizes = [16, 32], strides = [1, 1]} : vector<16x128xf32> to vector<16x32xf32>
    %51 = vector.extract_strided_slice %17 {offsets = [0, 32], sizes = [16, 32], strides = [1, 1]} : vector<16x128xf32> to vector<16x32xf32>
    %52 = vector.extract_strided_slice %22 {offsets = [0, 32], sizes = [16, 32], strides = [1, 1]} : vector<16x128xf32> to vector<16x32xf32>
    %cst_39 = arith.constant dense<0.000000e+00> : vector<16x16xf32>
    %53 = tpu.matmul %50, %51, %cst_39 {dimension_numbers = #tpu.dot_dimension_numbers<[1], [1], [0], [0], [0, 0, 1, 0], [], []>} : vector<16x32xf32>, vector<16x32xf32>, vector<16x16xf32> -> vector<16x16xf32>
    %cst_40 = arith.constant 0.176776692 : f32
    %54 = vector.broadcast %cst_40 : f32 to vector<16x16xf32>
    %55 = arith.mulf %53, %54 : vector<16x16xf32>
    %cst_41 = arith.constant -1.000000e+09 : f32
    %56 = vector.broadcast %cst_41 : f32 to vector<16x16xf32>
    %57 = arith.select %24, %56, %55 : vector<16x16xi1>, vector<16x16xf32>
    %cst_42 = arith.constant dense<0xFF800000> : vector<16xf32>
    %58 = vector.multi_reduction <maximumf>, %57, %cst_42 [1] : vector<16x16xf32> to vector<16xf32>
    %59 = vector.shape_cast %58 : vector<16xf32> to vector<16x1xf32>
    %60 = vector.broadcast %59 : vector<16x1xf32> to vector<16x16xf32>
    %61 = arith.subf %57, %60 : vector<16x16xf32>
    %62 = math.exp %61 : vector<16x16xf32>
    %cst_43 = arith.constant dense<0.000000e+00> : vector<16xf32>
    %63 = vector.multi_reduction <add>, %62, %cst_43 [1] : vector<16x16xf32> to vector<16xf32>
    %64 = vector.shape_cast %63 : vector<16xf32> to vector<16x1xf32>
    %65 = vector.broadcast %64 : vector<16x1xf32> to vector<16x16xf32>
    %66 = arith.divf %62, %65 : vector<16x16xf32>
    %c0_44 = arith.constant 0 : index
    %c1 = arith.constant 1 : index
    %c0_45 = arith.constant 0 : index
    %c0_46 = arith.constant 0 : index
    %67 = vector.load %arg14[%c0_44, %c1, %c0_45, %c0_46] : memref<1x4x16x16xf32, #tpu.memory_space<vmem>>, vector<1x1x16x16xf32>
    %68 = vector.shape_cast %67 : vector<1x1x16x16xf32> to vector<16x16xf32>
    %69 = vector.shape_cast %66 : vector<16x16xf32> to vector<1x1x16x16xf32>
    tpu.vector_store %arg14[%c0_44, %c1, %c0_45, %c0_46], %69 {strides = array<i32>} : memref<1x4x16x16xf32, #tpu.memory_space<vmem>>, vector<1x1x16x16xf32>,
    %cst_47 = arith.constant dense<0.000000e+00> : vector<16x32xf32>
    %70 = tpu.matmul %66, %52, %cst_47 {dimension_numbers = #tpu.dot_dimension_numbers<[1], [0], [0], [1], [0, 0, 1, 1], [], []>} : vector<16x16xf32>, vector<16x32xf32>, vector<16x32xf32> -> vector<16x32xf32>
    %c0_48 = arith.constant 0 : index
    %c32 = arith.constant 32 : index
    %71 = vector.load %arg11[%c0_48, %c32] : memref<128x128xf32, #tpu.memory_space<vmem>>, vector<128x32xf32>
    %cst_49 = arith.constant dense<0.000000e+00> : vector<16x128xf32>
    %72 = tpu.matmul %70, %71, %cst_49 {dimension_numbers = #tpu.dot_dimension_numbers<[1], [1], [0], [0], [0, 0, 1, 0], [], []>} : vector<16x32xf32>, vector<128x32xf32>, vector<16x128xf32> -> vector<16x128xf32>
    %73 = arith.addf %49, %72 : vector<16x128xf32>
    %74 = vector.extract_strided_slice %12 {offsets = [0, 64], sizes = [16, 32], strides = [1, 1]} : vector<16x128xf32> to vector<16x32xf32>
    %75 = vector.extract_strided_slice %17 {offsets = [0, 64], sizes = [16, 32], strides = [1, 1]} : vector<16x128xf32> to vector<16x32xf32>
    %76 = vector.extract_strided_slice %22 {offsets = [0, 64], sizes = [16, 32], strides = [1, 1]} : vector<16x128xf32> to vector<16x32xf32>
    %cst_50 = arith.constant dense<0.000000e+00> : vector<16x16xf32>
    %77 = tpu.matmul %74, %75, %cst_50 {dimension_numbers = #tpu.dot_dimension_numbers<[1], [1], [0], [0], [0, 0, 1, 0], [], []>} : vector<16x32xf32>, vector<16x32xf32>, vector<16x16xf32> -> vector<16x16xf32>
    %cst_51 = arith.constant 0.176776692 : f32
    %78 = vector.broadcast %cst_51 : f32 to vector<16x16xf32>
    %79 = arith.mulf %77, %78 : vector<16x16xf32>
    %cst_52 = arith.constant -1.000000e+09 : f32
    %80 = vector.broadcast %cst_52 : f32 to vector<16x16xf32>
    %81 = arith.select %24, %80, %79 : vector<16x16xi1>, vector<16x16xf32>
    %cst_53 = arith.constant dense<0xFF800000> : vector<16xf32>
    %82 = vector.multi_reduction <maximumf>, %81, %cst_53 [1] : vector<16x16xf32> to vector<16xf32>
    %83 = vector.shape_cast %82 : vector<16xf32> to vector<16x1xf32>
    %84 = vector.broadcast %83 : vector<16x1xf32> to vector<16x16xf32>
    %85 = arith.subf %81, %84 : vector<16x16xf32>
    %86 = math.exp %85 : vector<16x16xf32>
    %cst_54 = arith.constant dense<0.000000e+00> : vector<16xf32>
    %87 = vector.multi_reduction <add>, %86, %cst_54 [1] : vector<16x16xf32> to vector<16xf32>
    %88 = vector.shape_cast %87 : vector<16xf32> to vector<16x1xf32>
    %89 = vector.broadcast %88 : vector<16x1xf32> to vector<16x16xf32>
    %90 = arith.divf %86, %89 : vector<16x16xf32>
    %c0_55 = arith.constant 0 : index
    %c2 = arith.constant 2 : index
    %c0_56 = arith.constant 0 : index
    %c0_57 = arith.constant 0 : index
    %91 = vector.load %arg14[%c0_55, %c2, %c0_56, %c0_57] : memref<1x4x16x16xf32, #tpu.memory_space<vmem>>, vector<1x1x16x16xf32>
    %92 = vector.shape_cast %91 : vector<1x1x16x16xf32> to vector<16x16xf32>
    %93 = vector.shape_cast %90 : vector<16x16xf32> to vector<1x1x16x16xf32>
    tpu.vector_store %arg14[%c0_55, %c2, %c0_56, %c0_57], %93 {strides = array<i32>} : memref<1x4x16x16xf32, #tpu.memory_space<vmem>>, vector<1x1x16x16xf32>,
    %cst_58 = arith.constant dense<0.000000e+00> : vector<16x32xf32>
    %94 = tpu.matmul %90, %76, %cst_58 {dimension_numbers = #tpu.dot_dimension_numbers<[1], [0], [0], [1], [0, 0, 1, 1], [], []>} : vector<16x16xf32>, vector<16x32xf32>, vector<16x32xf32> -> vector<16x32xf32>
    %c0_59 = arith.constant 0 : index
    %c64 = arith.constant 64 : index
    %95 = vector.load %arg11[%c0_59, %c64] : memref<128x128xf32, #tpu.memory_space<vmem>>, vector<128x32xf32>
    %cst_60 = arith.constant dense<0.000000e+00> : vector<16x128xf32>
    %96 = tpu.matmul %94, %95, %cst_60 {dimension_numbers = #tpu.dot_dimension_numbers<[1], [1], [0], [0], [0, 0, 1, 0], [], []>} : vector<16x32xf32>, vector<128x32xf32>, vector<16x128xf32> -> vector<16x128xf32>
    %97 = arith.addf %73, %96 : vector<16x128xf32>
    %98 = vector.extract_strided_slice %12 {offsets = [0, 96], sizes = [16, 32], strides = [1, 1]} : vector<16x128xf32> to vector<16x32xf32>
    %99 = vector.extract_strided_slice %17 {offsets = [0, 96], sizes = [16, 32], strides = [1, 1]} : vector<16x128xf32> to vector<16x32xf32>
    %100 = vector.extract_strided_slice %22 {offsets = [0, 96], sizes = [16, 32], strides = [1, 1]} : vector<16x128xf32> to vector<16x32xf32>
    %cst_61 = arith.constant dense<0.000000e+00> : vector<16x16xf32>
    %101 = tpu.matmul %98, %99, %cst_61 {dimension_numbers = #tpu.dot_dimension_numbers<[1], [1], [0], [0], [0, 0, 1, 0], [], []>} : vector<16x32xf32>, vector<16x32xf32>, vector<16x16xf32> -> vector<16x16xf32>
    %cst_62 = arith.constant 0.176776692 : f32
    %102 = vector.broadcast %cst_62 : f32 to vector<16x16xf32>
    %103 = arith.mulf %101, %102 : vector<16x16xf32>
    %cst_63 = arith.constant -1.000000e+09 : f32
    %104 = vector.broadcast %cst_63 : f32 to vector<16x16xf32>
    %105 = arith.select %24, %104, %103 : vector<16x16xi1>, vector<16x16xf32>
    %cst_64 = arith.constant dense<0xFF800000> : vector<16xf32>
    %106 = vector.multi_reduction <maximumf>, %105, %cst_64 [1] : vector<16x16xf32> to vector<16xf32>
    %107 = vector.shape_cast %106 : vector<16xf32> to vector<16x1xf32>
    %108 = vector.broadcast %107 : vector<16x1xf32> to vector<16x16xf32>
    %109 = arith.subf %105, %108 : vector<16x16xf32>
    %110 = math.exp %109 : vector<16x16xf32>
    %cst_65 = arith.constant dense<0.000000e+00> : vector<16xf32>
    %111 = vector.multi_reduction <add>, %110, %cst_65 [1] : vector<16x16xf32> to vector<16xf32>
    %112 = vector.shape_cast %111 : vector<16xf32> to vector<16x1xf32>
    %113 = vector.broadcast %112 : vector<16x1xf32> to vector<16x16xf32>
    %114 = arith.divf %110, %113 : vector<16x16xf32>
    %c0_66 = arith.constant 0 : index
    %c3 = arith.constant 3 : index
    %c0_67 = arith.constant 0 : index
    %c0_68 = arith.constant 0 : index
    %115 = vector.load %arg14[%c0_66, %c3, %c0_67, %c0_68] : memref<1x4x16x16xf32, #tpu.memory_space<vmem>>, vector<1x1x16x16xf32>
    %116 = vector.shape_cast %115 : vector<1x1x16x16xf32> to vector<16x16xf32>
    %117 = vector.shape_cast %114 : vector<16x16xf32> to vector<1x1x16x16xf32>
    tpu.vector_store %arg14[%c0_66, %c3, %c0_67, %c0_68], %117 {strides = array<i32>} : memref<1x4x16x16xf32, #tpu.memory_space<vmem>>, vector<1x1x16x16xf32>,
    %cst_69 = arith.constant dense<0.000000e+00> : vector<16x32xf32>
    %118 = tpu.matmul %114, %100, %cst_69 {dimension_numbers = #tpu.dot_dimension_numbers<[1], [0], [0], [1], [0, 0, 1, 1], [], []>} : vector<16x16xf32>, vector<16x32xf32>, vector<16x32xf32> -> vector<16x32xf32>
    %c0_70 = arith.constant 0 : index
    %c96 = arith.constant 96 : index
    %119 = vector.load %arg11[%c0_70, %c96] : memref<128x128xf32, #tpu.memory_space<vmem>>, vector<128x32xf32>
    %cst_71 = arith.constant dense<0.000000e+00> : vector<16x128xf32>
    %120 = tpu.matmul %118, %119, %cst_71 {dimension_numbers = #tpu.dot_dimension_numbers<[1], [1], [0], [0], [0, 0, 1, 0], [], []>} : vector<16x32xf32>, vector<128x32xf32>, vector<16x128xf32> -> vector<16x128xf32>
    %121 = arith.addf %97, %120 : vector<16x128xf32>
    %c0_72 = arith.constant 0 : index
    %c0_73 = arith.constant 0 : index
    %122 = vector.load %arg12[%c0_72, %c0_73] : memref<1x128xf32, #tpu.memory_space<vmem>>, vector<1x128xf32>
    %123 = vector.broadcast %122 : vector<1x128xf32> to vector<16x128xf32>
    %124 = arith.addf %121, %123 : vector<16x128xf32>
    %c0_74 = arith.constant 0 : index
    %c0_75 = arith.constant 0 : index
    %c0_76 = arith.constant 0 : index
    %125 = vector.load %arg13[%c0_74, %c0_75, %c0_76] : memref<1x16x128xf32, #tpu.memory_space<vmem>>, vector<1x16x128xf32>
    %126 = vector.shape_cast %125 : vector<1x16x128xf32> to vector<16x128xf32>
    %127 = vector.shape_cast %124 : vector<16x128xf32> to vector<1x16x128xf32>
    tpu.vector_store %arg13[%c0_74, %c0_75, %c0_76], %127 {strides = array<i32>} : memref<1x16x128xf32, #tpu.memory_space<vmem>>, vector<1x16x128xf32>,
    return
  }
  func.func @transform_0(%arg0: i32) -> (i32, i32, i32) {
    %c0_i32 = arith.constant 0 : i32
    %c0_i32_0 = arith.constant 0 : i32
    %c0_i32_1 = arith.constant 0 : i32
    return %arg0, %c0_i32, %c0_i32_0 : i32, i32, i32
  }
  func.func @transform_1(%arg0: i32) -> (i32, i32, i32) {
    %c0_i32 = arith.constant 0 : i32
    %c0_i32_0 = arith.constant 0 : i32
    %c0_i32_1 = arith.constant 0 : i32
    return %arg0, %c0_i32, %c0_i32_0 : i32, i32, i32
  }
  func.func @transform_2(%arg0: i32) -> (i32, i32, i32) {
    %c0_i32 = arith.constant 0 : i32
    %c0_i32_0 = arith.constant 0 : i32
    %c0_i32_1 = arith.constant 0 : i32
    return %arg0, %c0_i32, %c0_i32_0 : i32, i32, i32
  }
  func.func @transform_3(%arg0: i32) -> (i32, i32, i32) {
    %c0_i32 = arith.constant 0 : i32
    %c0_i32_0 = arith.constant 0 : i32
    %c0_i32_1 = arith.constant 0 : i32
    return %arg0, %c0_i32, %c0_i32_0 : i32, i32, i32
  }
  func.func @transform_4(%arg0: i32) -> (i32, i32) {
    %c0_i32 = arith.constant 0 : i32
    %c0_i32_0 = arith.constant 0 : i32
    %c0_i32_1 = arith.constant 0 : i32
    return %c0_i32, %c0_i32_0 : i32, i32
  }
  func.func @transform_5(%arg0: i32) -> (i32, i32) {
    %c0_i32 = arith.constant 0 : i32
    %c0_i32_0 = arith.constant 0 : i32
    %c0_i32_1 = arith.constant 0 : i32
    return %c0_i32, %c0_i32_0 : i32, i32
  }
  func.func @transform_6(%arg0: i32) -> (i32, i32) {
    %c0_i32 = arith.constant 0 : i32
    %c0_i32_0 = arith.constant 0 : i32
    %c0_i32_1 = arith.constant 0 : i32
    return %c0_i32, %c0_i32_0 : i32, i32
  }
  func.func @transform_7(%arg0: i32) -> (i32, i32) {
    %c0_i32 = arith.constant 0 : i32
    %c0_i32_0 = arith.constant 0 : i32
    %c0_i32_1 = arith.constant 0 : i32
    return %c0_i32, %c0_i32_0 : i32, i32
  }
  func.func @transform_8(%arg0: i32) -> (i32, i32) {
    %c0_i32 = arith.constant 0 : i32
    %c0_i32_0 = arith.constant 0 : i32
    %c0_i32_1 = arith.constant 0 : i32
    return %c0_i32, %c0_i32_0 : i32, i32
  }
  func.func @transform_9(%arg0: i32) -> (i32, i32) {
    %c0_i32 = arith.constant 0 : i32
    %c0_i32_0 = arith.constant 0 : i32
    %c0_i32_1 = arith.constant 0 : i32
    return %c0_i32, %c0_i32_0 : i32, i32
  }
  func.func @transform_10(%arg0: i32) -> (i32, i32) {
    %c0_i32 = arith.constant 0 : i32
    %c0_i32_0 = arith.constant 0 : i32
    %c0_i32_1 = arith.constant 0 : i32
    return %c0_i32, %c0_i32_0 : i32, i32
  }
  func.func @transform_11(%arg0: i32) -> (i32, i32) {
    %c0_i32 = arith.constant 0 : i32
    %c0_i32_0 = arith.constant 0 : i32
    %c0_i32_1 = arith.constant 0 : i32
    return %c0_i32, %c0_i32_0 : i32, i32
  }
  func.func @transform_12(%arg0: i32) -> (i32, i32, i32) {
    %c0_i32 = arith.constant 0 : i32
    %c0_i32_0 = arith.constant 0 : i32
    %c0_i32_1 = arith.constant 0 : i32
    return %arg0, %c0_i32, %c0_i32_0 : i32, i32, i32
  }
  func.func @transform_13(%arg0: i32) -> (i32, i32, i32, i32) {
    %c0_i32 = arith.constant 0 : i32
    %c0_i32_0 = arith.constant 0 : i32
    %c0_i32_1 = arith.constant 0 : i32
    %c0_i32_2 = arith.constant 0 : i32
    return %arg0, %c0_i32, %c0_i32_0, %c0_i32_1 : i32, i32, i32, i32
  }
}

</mosaic_0001>

<bundles_post_ra>
// kernel: tpu_custom_call.1
= control target key start
LH: loop header
LB: loop body
LE: loop exit
PB: predicated region body
PF: predicated region fallthrough
CT: control target
= control target key end

     0   :  { %s3495_s0 = inlined_call_operand.hbm [shape: f32[2,16,128], index: 0, kind: input, shape index: {}]   ;;  %s3496_s1 = inlined_call_operand.hbm [shape: f32[2,16,128], index: 1, kind: input, shape index: {}]   ;;  %s3497_s2 = inlined_call_operand.hbm [shape: f32[2,16,128], index: 2, kind: input, shape index: {}]   ;;  %s3498_s3 = inlined_call_operand.hbm [shape: s32[2,16,16], index: 3, kind: input, shape index: {}]   ;;  %s3499_s4 = inlined_call_operand.hbm [shape: f32[128,128], index: 4, kind: input, shape index: {}]   ;;  %s3500_s5 = inlined_call_operand.vmem [shape: f32[1,128], index: 5, kind: input, shape index: {}]   ;;  %s3501_s6 = inlined_call_operand.hbm [shape: f32[128,128], index: 6, kind: input, shape index: {}]   ;;  %s3502_s7 = inlined_call_operand.vmem [shape: f32[1,128], index: 7, kind: input, shape index: {}]   ;;  %s3503_s8 = inlined_call_operand.hbm [shape: f32[128,128], index: 8, kind: input, shape index: {}]   ;;  %s3504_s9 = inlined_call_operand.vmem [shape: f32[1,128], index: 9, kind: input, shape index: {}]   ;;  %s3505_s10 = inlined_call_operand.hbm [shape: f32[128,128], index: 10, kind: input, shape index: {}]   ;;  %s3506_s11 = inlined_call_operand.vmem [shape: f32[1,128], index: 11, kind: input, shape index: {}]   ;;  %s3507_s12 = inlined_call_operand.hbm [shape: f32[2,16,128], index: 12, kind: output, shape index: {0}]   ;;  %s3508_s13 = inlined_call_operand.hbm [shape: f32[2,4,16,16], index: 13, kind: output, shape index: {1}]  }
   0x1   :  { %3524 = sst [smem:[#allocation32_spill]] %s3496_s1 }
   0x2   :  { %3525 = sst [smem:[#allocation33_spill]] %s3499_s4 }
   0x3   :  { %3526 = sst [smem:[#allocation34_spill]] %s3501_s6 }
   0x4   :  { %3527 = sst [smem:[#allocation35_spill]] %s3503_s8 }
   0x5   :  { %3528 = sst [smem:[#allocation36_spill]] %s3505_s10 }
   0x6   :  { %3529 = sst [smem:[#allocation37_spill]] %s3506_s11 }
   0x7   :  { %3530 = sst [smem:[#allocation38_spill]] %s3507_s12 }
   0x8   :  { %3531 = sst [smem:[#allocation39_spill]] %s3508_s13 }
   0x9   :  { %19 = vsyncpa [#allocation3], 0 }
   0xa   :  { %21 = vsyncpa [#allocation3 + $0x1], 0 }
   0xb   :  { %22 = vsyncpa [#allocation6], 0 }
   0xc   :  { %24 = vsyncpa [#allocation6 + $0x1], 0 }
   0xd   :  { %25 = vsyncpa [#allocation9], 0 }
   0xe   :  { %27 = vsyncpa [#allocation9 + $0x1], 0 }
   0xf   :  { %28 = vsyncpa [#allocation12], 0 }
  0x10   :  { %29 = vsyncpa [#allocation15], 0 }
  0x11   :  { %30 = vsyncpa [#allocation4], 0 }
  0x12   :  { %32 = vsyncpa [#allocation4 + $0x1], 0 }
  0x13   :  { %33 = vsyncpa [#allocation18], 0 }
  0x14   :  { %35 = vsyncpa [#allocation18 + $0x1], 0  ;;  %s2789_s25 = smov 0   ;;  %s2791_s26 = smov 0  }
  0x15   :  { %s2793_s27 = smov 0   ;;  %s2795_s28 = smov 0  }
  0x16 LB: > { %3532 = sst [smem:[#allocation27_spill]] %s2694_s25  ;;  %s2810_s29 = sadd.s32 4294967295, %s2706_s28   ;;  %s2706_s28 = sphi %s2795_s28, %s3565_s28   ;;  %s2702_s27 = sphi %s2793_s27, %s3569_s27   ;;  %s2698_s26 = sphi %s2791_s26, %s3568_s26   ;;  %s2694_s25 = sphi %s2789_s25, %s3567_s25  }
  0x17   : > { %s2037_s30 = sadd.s32 4294967294, %s2706_s28   ;;  %p61_p0 = scmp.ne.s32.totalorder %s2698_s26, %s2694_s25 }
  0x18   : > { %p3520_p1 = scmp.eq.s32.totalorder %s2810_s29, 0  ;;  %p331_p2 = scmp.eq.s32.totalorder %s2810_s29, 1 }
  0x19   : > { %p337_p3 = scmp.eq.s32.totalorder %s2037_s30, 1  ;;  %p2038_p5 = scmp.ge.s32.totalorder %s2706_s28, 1 }
  0x1a   : > { %p2819_p4 = por %p3520_p1, %p61_p0  ;;  %p370_p7 = scmp.lt.s32.totalorder %s2706_s28, 3 }
  0x1b   : > { %p2824_p6 = por %p337_p3, %p61_p0  ;;  %s3536_s4 = sld [smem:[#allocation33_spill]] }
  0x1c   : > { %p2832_p8 = pnand %p2038_p5, %p370_p7  ;;  %s2708_s20 = smov [#allocation10]  }
  0x1d   : > { %s3534_s15 = scalar_select %p2824_p6, 1, 0 }
  0x1e   : > { %p2211_p9 = pneg %p2832_p8  ;;  %s383_s21 = sshll.u32 %s2708_s20, 4  ;;  %s384_s21 = int_to_ptr.vmem [resolvable:$true] %s383_s21 }
  0x1f   : > { %3535 = sst [smem:[#allocation28_spill]] %s3534_s15  ;;  %s3509_s16 = smov 128  }
  0x20   : > { %p2840_p10 = pnand %p2211_p9, %p3520_p1  ;;  %s3539_s6 = sld [smem:[#allocation34_spill]] }
  0x21   : > { %s381_s18 = sshll.u32 %s3536_s4, 4  ;;  %s3511_s17 = smov 8   ;;  %s382_s18 = int_to_ptr.hbm [resolvable:$true] %s381_s18 }
  0x22   : > { %2214 = dma.hbm_to_vmem [thread:$0]  (!%p2840_p10), %s382_s18, 2048, %s384_s21, [#allocation9], %s3509_s16, %s3509_s16, %s3511_s17  }
  0x23   : > { %s2711_s20 = smov [#allocation11]   ;;  %s2859_s23 = sadd.s32 1, %s2706_s28  }
  0x24   : > { %s400_s4 = sshll.u32 %s2711_s20, 4  ;;  %3540 = sst [smem:[#allocation29_spill]] %s2859_s23  ;;  %s401_s4 = int_to_ptr.vmem [resolvable:$true] %s400_s4 }
  0x25   : > { %s48_s24 = sadd.s32 1, %s2702_s27  ;;  %p55_p12 = scmp.ne.s32.totalorder %s2702_s27, %s2698_s26 }
  0x26   : > { %s398_s30 = sshll.u32 %s3539_s6, 4  ;;  %s45_s6 = ssub.s32 %s2706_s28, %s2859_s23  ;;  %s399_s30 = int_to_ptr.hbm [resolvable:$true] %s398_s30 }
  0x27   : > { %2217 = dma.hbm_to_vmem [thread:$0]  (!%p2840_p10), %s399_s30, 2048, %s401_s4, [#allocation12], %s3509_s16, %s3509_s16, %s3511_s17  }
  0x28   : > { %p46_p13 = scmp.eq.s32.totalorder %s45_s6, 0  ;;  %p56_p0 = scmp.eq.s32.totalorder %s2706_s28, 0 }
  0x29   : > { %p2869_p3 = por %p331_p2, %p55_p12  ;;  %p2248_p5 = scmp.lt.s32.totalorder %s2706_s28, 2 }
  0x2a   : > { %s2875_s21 = scalar_select %p46_p13, %s2702_s27, %s48_s24  }
  0x2b   : > { %s3541_s18 = scalar_select %p2869_p3, 1, 0 }
  0x2c   : > { %3543 = sst [smem:[#allocation31_spill]] %s2875_s21  ;;  %p57_p7 = por %p56_p0, %p55_p12 }
  0x2d   : > { %3542 = sst [smem:[#allocation30_spill]] %s3541_s18  ;;  %s3517_s20 = sand.u32 1, %s2702_s27  }
  0x2e   : > { %s2880_s4 = sshll.u32 %s3517_s20, 4  ;;  %s2883_s30 = sshll.u32 %s2706_s28, 4 }
  0x2f   : > { %p2885_p9 = pnand %p2248_p5, %p57_p7  ;;  %s3521_s16 = sand.u32 1, %s2706_s28  }
  0x30   : > { %s3545_s1 = sld [smem:[#allocation32_spill]]  ;;  %s477_s15 = scalar_lea.vmem [#allocation5], %s2880_s4 }
  0x31   : > { %s485_s25 = sshll.u32 %s477_s15, 4  ;;  %s2897_s20 = scalar_lea.sflag [#allocation6], %s3521_s16  ;;  %s486_s25 = int_to_ptr.vmem [resolvable:$true] %s485_s25 }
  0x32   : > { %p2412_p12 = pneg %p2885_p9 }
  0x36   : > { %s482_s24 = scalar_lea.hbm %s3545_s1, %s2883_s30 }
  0x37   : > { %s483_s21 = sshll.u32 %s482_s24, 4  ;;  %s2415_s24 = scalar_lea.hbm %s3545_s1, 32  ;;  %s484_s21 = int_to_ptr.hbm [resolvable:$true] %s483_s21 }
  0x38   : > { %s2408_s12 = sshra.s32 %s484_s21, 4  ;;  %s2409_s12 = int_to_ptr.hbm [resolvable:$true] %s2408_s12 }
  0x39   : > { %s2410_s11 = scalar_lea.hbm %s2409_s12, 16  ;;  %p2416_p5 = scmp.lt.s32.totalorder %s2409_s12, %s3545_s1 }
  0x3a   : > { %p2411_p2 = scmp.ne.s32.totalorder %s2409_s12, %s2410_s11  ;;  %p2417_p7 = scmp.lt.s32.totalorder %s2415_s24, %s2410_s11 }
  0x3c   : > { %p2413_p13 = pnand %p2412_p12, %p2411_p2  ;;  %p2418_p11 = por %p2417_p7, %p2416_p5 }
  0x3e   : > { %p2414_p0 = pneg %p2413_p13 }
  0x40   : > { %p2419_p1 = pnand %p2418_p11, %p2414_p0 }
  0x42   : > { %2422 = shalt.err (!%p2419_p1)
}
  0x43   : > { %s3546_s16 = smov 8   ;;  %s3547_s18 = smov 128  }
  0x44   : > { %2230 = dma.hbm_to_vmem [thread:$0]  (!%p2885_p9), %s484_s21, 256, %s486_s25, %s2897_s20, %s3547_s18, %s3547_s18, %s3546_s16  }
  0x45   : > { %s3548_s8 = sld [smem:[#allocation35_spill]]  ;;  %s2712_s11 = smov [#allocation13]  }
  0x46   : > { %s417_s12 = sshll.u32 %s2712_s11, 4  ;;  %s3549_s10 = sld [smem:[#allocation36_spill]]  ;;  %s418_s12 = int_to_ptr.vmem [resolvable:$true] %s417_s12 }
  0x47   : > { %s2713_s25 = smov [#allocation14]   ;;  %s455_s24 = scalar_lea.vmem [#allocation2], %s2880_s4 }
  0x48   : > { %s434_s21 = sshll.u32 %s2713_s25, 4  ;;  %s463_s15 = sshll.u32 %s455_s24, 4  ;;  %s435_s21 = int_to_ptr.vmem [resolvable:$true] %s434_s21  ;;  %s464_s15 = int_to_ptr.vmem [resolvable:$true] %s463_s15 }
  0x49   : > { %s2505_s23 = scalar_lea.hbm %s3495_s0, 32 }
  0x4b   : > { %s415_s13 = sshll.u32 %s3548_s8, 4  ;;  %s460_s8 = scalar_lea.hbm %s3495_s0, %s2883_s30  ;;  %s416_s13 = int_to_ptr.hbm [resolvable:$true] %s415_s13 }
  0x4c   : > { %s432_s1 = sshll.u32 %s3549_s10, 4  ;;  %s461_s11 = sshll.u32 %s460_s8, 4  ;;  %s433_s1 = int_to_ptr.hbm [resolvable:$true] %s432_s1  ;;  %s462_s11 = int_to_ptr.hbm [resolvable:$true] %s461_s11 }
  0x4d   : > { %2220 = dma.hbm_to_vmem [thread:$0]  (!%p2840_p10), %s416_s13, 2048, %s418_s12, [#allocation12], %s3547_s18, %s3547_s18, %s3546_s16  }
  0x4e   : > { %2223 = dma.hbm_to_vmem [thread:$0]  (!%p2840_p10), %s433_s1, 2048, %s435_s21, [#allocation15], %s3547_s18, %s3547_s18, %s3546_s16  }
  0x4f   : > { %s3550_s10 = sand.u32 1, %s2702_s27   ;;  %s2498_s12 = sshra.s32 %s462_s11, 4  ;;  %s2499_s12 = int_to_ptr.hbm [resolvable:$true] %s2498_s12 }
  0x50   : > { %s452_s13 = scalar_lea.sflag [#allocation3], %s3550_s10  ;;  %s2500_s25 = scalar_lea.hbm %s2499_s12, 16 }
  0x51   : > { %p2501_p1 = scmp.ne.s32.totalorder %s2499_s12, %s2500_s25  ;;  %p2506_p10 = scmp.lt.s32.totalorder %s2499_s12, %s3495_s0 }
  0x52   : > { %p2507_p13 = scmp.lt.s32.totalorder %s2505_s23, %s2500_s25 }
  0x53   : > { %p2503_p11 = pnand %p2501_p1, %p2412_p12 }
  0x54   : > { %p2508_p0 = por %p2507_p13, %p2506_p10 }
  0x55   : > { %p2504_p2 = pneg %p2503_p11 }
  0x57   : > { %p2509_p5 = pnand %p2508_p0, %p2504_p2 }
  0x59   : > { %2512 = shalt.err (!%p2509_p5)
}
  0x5a   : > { %2227 = dma.hbm_to_vmem [thread:$0]  (!%p2885_p9), %s462_s11, 256, %s464_s15, %s452_s13, %s3547_s18, %s3547_s18, %s3546_s16  }
  0x5b   : > { %s504_s24 = scalar_lea.hbm %s3497_s2, %s2883_s30  ;;  %s499_s17 = scalar_lea.vmem [#allocation7], %s2880_s4 }
  0x5c   : > { %s505_s22 = sshll.u32 %s504_s24, 4  ;;  %s507_s12 = sshll.u32 %s499_s17, 4  ;;  %s506_s22 = int_to_ptr.hbm [resolvable:$true] %s505_s22  ;;  %s508_s12 = int_to_ptr.vmem [resolvable:$true] %s507_s12 }
  0x5d   : > { %s2528_s25 = sshra.s32 %s506_s22, 4  ;;  %s2535_s11 = scalar_lea.hbm %s3497_s2, 32  ;;  %s2529_s25 = int_to_ptr.hbm [resolvable:$true] %s2528_s25 }
  0x5e   : > { %s2530_s23 = scalar_lea.hbm %s2529_s25, 16  ;;  %p2536_p2 = scmp.lt.s32.totalorder %s2529_s25, %s3497_s2 }
  0x5f   : > { %p2531_p7 = scmp.ne.s32.totalorder %s2529_s25, %s2530_s23  ;;  %p2537_p10 = scmp.lt.s32.totalorder %s2535_s11, %s2530_s23 }
  0x61   : > { %p2533_p1 = pnand %p2531_p7, %p2412_p12  ;;  %p2538_p13 = por %p2537_p10, %p2536_p2 }
  0x63   : > { %p2534_p11 = pneg %p2533_p1 }
  0x65   : > { %p2539_p0 = pnand %p2538_p13, %p2534_p11 }
  0x67   : > { %2542 = shalt.err (!%p2539_p0)
}
  0x68   : > { %2233 = dma.hbm_to_vmem [thread:$0]  (!%p2885_p9), %s506_s22, 256, %s508_s12, %s2897_s20, %s3547_s18, %s3547_s18, %s3546_s16  }
  0x69   : > { %s526_s24 = scalar_lea.hbm %s3498_s3, %s2883_s30  ;;  %s521_s25 = scalar_lea.vmem [#allocation8], %s2880_s4 }
  0x6a   : > { %s527_s17 = sshll.u32 %s526_s24, 4  ;;  %s529_s23 = sshll.u32 %s521_s25, 4  ;;  %s528_s17 = int_to_ptr.hbm [resolvable:$true] %s527_s17  ;;  %s530_s23 = int_to_ptr.vmem [resolvable:$true] %s529_s23 }
  0x6b   : > { %s3551_s1 = sand.u32 1, %s2706_s28   ;;  %s2558_s11 = sshra.s32 %s528_s17, 4  ;;  %s2559_s11 = int_to_ptr.hbm [resolvable:$true] %s2558_s11 }
  0x6c   : > { %s518_s8 = scalar_lea.sflag [#allocation9], %s3551_s1  ;;  %s2560_s15 = scalar_lea.hbm %s2559_s11, 16 }
  0x6d   : > { %p2561_p5 = scmp.ne.s32.totalorder %s2559_s11, %s2560_s15  ;;  %s2565_s12 = scalar_lea.hbm %s3498_s3, 32 }
  0x6e   : > { %p2566_p11 = scmp.lt.s32.totalorder %s2559_s11, %s3498_s3  ;;  %p2567_p2 = scmp.lt.s32.totalorder %s2565_s12, %s2560_s15 }
  0x6f   : > { %p2563_p7 = pnand %p2561_p5, %p2412_p12 }
  0x70   : > { %p2568_p10 = por %p2567_p2, %p2566_p11 }
  0x71   : > { %p2564_p1 = pneg %p2563_p7 }
  0x73   : > { %p2569_p13 = pnand %p2568_p10, %p2564_p1 }
  0x75   : > { %2572 = shalt.err (!%p2569_p13)
}
  0x76   : > { %2236 = dma.hbm_to_vmem [thread:$0]  (!%p2885_p9), %s528_s17, 256, %s530_s23, %s518_s8, %s3547_s18, %s3547_s18, %s3546_s16  }
  0x77   : > { %541 = sbr.rel (%p2832_p8) target bundleno = 1645 (0x66d), region = 68  ;;  %s2997_s4 = sand.u32 (!%p2832_p8), 1, %s2698_s26  }
  0x78   : > { %s3000_s10 = sshll.u32 (!%p2832_p8), %s2997_s4, 4  ;;  %s544_s21 = scalar_lea.sflag (!%p2832_p8), [#allocation3], %s2997_s4 }
  0x79   : > { %s547_s24 = scalar_lea.vmem (!%p2832_p8), [#allocation2], %s3000_s10 }
  0x7c   : > { %2661 = dma.done.wait (%p2819_p4), %s544_s21, 256  }
  0x7d   : > { %2663 = vsyncadd (%p2819_p4), %s544_s21, 4294967040  ;;  %s553_s19 = sand.u32 1, %s2810_s29   ;;  %s557_s18 = scalar_lea.vmem [#allocation5], %s3000_s10 }
  0x7e   : > { %s554_s16 = scalar_lea.sflag [#allocation6], %s553_s19 }
  0x7f   : > { %2665 = dma.done.wait (%p2819_p4), %s554_s16, 512  }
  0x80   : > { %2667 = vsyncadd (%p2819_p4), %s554_s16, 4294966784  ;;  %s567_s6 = scalar_lea.vmem [#allocation7], %s3000_s10  ;;  %s574_s17 = scalar_lea.sflag [#allocation9], %s553_s19 }
  0x81   : > { %s577_s25 = scalar_lea.vmem [#allocation8], %s3000_s10 }
  0x82   : > { %2669 = dma.done.wait (%p2819_p4), %s574_s17, 256  }
  0x83   : > { %2671 = vsyncadd (%p2819_p4), %s574_s17, 4294967040  ;;  %p3552_p8 = scmp.eq.s32.totalorder %s2810_s29, 0 }
  0x85   : > { %2673 = dma.done.wait (%p3552_p8), [#allocation9], 2048   ;;  %p3553_p9 = pmov %p3552_p8 }
  0x86   : > { %p3554_p12 = pmov %p3552_p8 }
  0x87   : > { %2675 = vsyncadd (%p3553_p9), [#allocation9], 4294965248 }
  0x88   : > { %2677 = dma.done.wait (%p3554_p12), [#allocation12], 4096   ;;  %p3555_p0 = pmov %p3552_p8 }
  0x8a   : > { %2679 = vsyncadd (%p3555_p0), [#allocation12], 4294963200  ;;  %p3556_p5 = pmov %p3555_p0 }
  0x8b   : > { %p3557_p7 = pmov %p3555_p0 }
  0x8c   : > { %2681 = dma.done.wait (%p3556_p5), [#allocation15], 2048  }
  0x8d   : > { %2683 = vsyncadd (%p3557_p7), [#allocation15], 4294965248  ;;  %v727_v0 = vld [vmem:[#allocation11 + $0x78] sm:$0xff]  ;;  %v726_v2 = vld [vmem:[#allocation11 + $0x70] sm:$0xff]  ;;  %vm800_vm0 = vcmask 261120   ;;  %s2714_s11 = smov 96  }
  0x8e   : > { %732 = vmatpush.xpose.msra.mxu1 %v727_v0  ;;  %v684_v1 = vld [vmem:[#allocation10 + $0x78] sm:$0xff]  ;;  %v683_v3 = vld [vmem:[#allocation10 + $0x70] sm:$0xff]  ;;  %v725_v4 = vld [vmem:[#allocation11 + $0x68] sm:$0xff]  ;;  %s2715_s15 = smov 32   ;;  %s2716_s20 = smov 64   ;;  %vm840_vm2 = vcmask 130048  }
  0x8f   : > { %689 = vmatpush.xpose.msra.mxu0 %v684_v1  ;;  %v682_v5 = vld [vmem:[#allocation10 + $0x68] sm:$0xff]  ;;  %v724_v6 = vld [vmem:[#allocation11 + $0x60] sm:$0xff]  ;;  %v723_v8 = vld [vmem:[#allocation11 + $0x58] sm:$0xff]  ;;  %s2066_s30 = sshll.u32 %s2997_s4, 6  ;;  %s1795_s14 = scalar_lea.sflag [#allocation18], %s2997_s4 }
  0x90   : > { %v681_v7 = vld [vmem:[#allocation10 + $0x60] sm:$0xff]  ;;  %v680_v9 = vld [vmem:[#allocation10 + $0x58] sm:$0xff]  ;;  %v722_v10 = vld [vmem:[#allocation11 + $0x50] sm:$0xff]  ;;  %s3178_s13 = scalar_lea.vmem [#allocation17], %s2066_s30 }
  0x91   : > { %v679_v11 = vld [vmem:[#allocation10 + $0x50] sm:$0xff]  ;;  %v721_v12 = vld [vmem:[#allocation11 + $0x48] sm:$0xff]  ;;  %v720_v14 = vld [vmem:[#allocation11 + $0x40] sm:$0xff]  ;;  %s1824_s17 = sshll.u32 %s3178_s13, 4  ;;  %s1825_s17 = int_to_ptr.vmem [resolvable:$true] %s1824_s17 }
  0x92   : > { %733 = vmatpush.xpose.msra.mxu1 %v726_v2  ;;  %v678_v13 = vld [vmem:[#allocation10 + $0x48] sm:$0xff]  ;;  %v677_v15 = vld [vmem:[#allocation10 + $0x40] sm:$0xff]  ;;  %v719_v16 = vld [vmem:[#allocation11 + $0x38] sm:$0xff] }
  0x93   : > { %690 = vmatpush.xpose.msra.mxu0 %v683_v3  ;;  %v676_v17 = vld [vmem:[#allocation10 + $0x38] sm:$0xff]  ;;  %v718_v18 = vld [vmem:[#allocation11 + $0x30] sm:$0xff]  ;;  %v717_v20 = vld [vmem:[#allocation11 + $0x28] sm:$0xff] }
  0x94   : > { %v675_v19 = vld [vmem:[#allocation10 + $0x30] sm:$0xff]  ;;  %v674_v21 = vld [vmem:[#allocation10 + $0x28] sm:$0xff]  ;;  %v770_v22 = vld [vmem:[#allocation13 + $0x78] sm:$0xff] }
  0x95   : > { %775 = vmatpush.xpose.msra.mxu2 %v770_v22  ;;  %v716_v23 = vld [vmem:[#allocation11 + $0x20] sm:$0xff]  ;;  %v769_v24 = vld [vmem:[#allocation13 + $0x70] sm:$0xff]  ;;  %v715_v26 = vld [vmem:[#allocation11 + $0x18] sm:$0xff] }
  0x96   : > { %734 = vmatpush.xpose.msra.mxu1 %v725_v4  ;;  %v673_v25 = vld [vmem:[#allocation10 + $0x20] sm:$0xff]  ;;  %v768_v27 = vld [vmem:[#allocation13 + $0x68] sm:$0xff]  ;;  %v672_v28 = vld [vmem:[#allocation10 + $0x18] sm:$0xff] }
  0x97   : > { %691 = vmatpush.xpose.msra.mxu0 %v682_v5  ;;  %v714_v29 = vld [vmem:[#allocation11 + $0x10] sm:$0xff]  ;;  %v767_v30 = vld [vmem:[#allocation13 + $0x60] sm:$0xff]  ;;  %v713_v32 = vld [vmem:[#allocation11 + $0x8] sm:$0xff] }
  0x98   : > { %v671_v31 = vld [vmem:[#allocation10 + $0x10] sm:$0xff]  ;;  %v766_v33 = vld [vmem:[#allocation13 + $0x58] sm:$0xff]  ;;  %v670_v34 = vld [vmem:[#allocation10 + $0x8] sm:$0xff] }
  0x99   : > { %776 = vmatpush.xpose.msra.mxu2 %v769_v24  ;;  %v712_v35 = vld [vmem:[#allocation11] sm:$0xff]  ;;  %v765_v36 = vld [vmem:[#allocation13 + $0x50] sm:$0xff]  ;;  %v764_v40 = vld [vmem:[#allocation13 + $0x48] sm:$0xff] }
  0x9a   : > { %735 = vmatpush.xpose.msra.mxu1 %v724_v6  ;;  %v669_v37 = vld [vmem:[#allocation10] sm:$0xff]  ;;  %v664_v42 = vld [vmem:[%s557_s18 + $0x8] sm:$0xff]  ;;  %v761_v45 = vld [vmem:[#allocation13 + $0x30] sm:$0xff] }
  0x9b   : > { %692 = vmatpush.xpose.msra.mxu0 %v681_v7  ;;  %v663_v38 = vld [vmem:[%s557_s18] sm:$0xff]  ;;  %v662_v43 = vld [vmem:[%s547_s24 + $0x8] sm:$0xff]  ;;  %s3559_s18 = sld [smem:[#allocation39_spill]] }
  0x9c   : > { %v661_v39 = vld [vmem:[%s547_s24] sm:$0xff]  ;;  %v762_v44 = vld [vmem:[#allocation13 + $0x38] sm:$0xff]  ;;  %v760_v46 = vld [vmem:[#allocation13 + $0x28] sm:$0xff]  ;;  %s2182_s24 = sshll.u32 %s2810_s29, 6 }
  0x9d   : > { %777 = vmatpush.xpose.msra.mxu2 %v768_v27  ;;  %v763_v41 = vld [vmem:[#allocation13 + $0x40] sm:$0xff]  ;;  %v758_v48 = vld [vmem:[#allocation13 + $0x18] sm:$0xff]  ;;  %v757_v49 = vld [vmem:[#allocation13 + $0x10] sm:$0xff] }
  0x9e   : > { %736 = vmatpush.xpose.msra.mxu1 %v723_v8  ;;  %v759_v47 = vld [vmem:[#allocation13 + $0x20] sm:$0xff]  ;;  %v756_v50 = vld [vmem:[#allocation13 + $0x8] sm:$0xff]  ;;  %v3058_v63 = vld [vmem:[#allocation14 + $0x78] sm:$0xff] }
  0x9f   : > { %693 = vmatpush.xpose.msra.mxu0 %v680_v9  ;;  %v755_v51 = vld [vmem:[#allocation13] sm:$0xff]  ;;  %v666_v53 = vld [vmem:[%s567_s6 + $0x8] sm:$0xff]  ;;  %v3067_v1 = vld [vmem:[#allocation14 + $0x70] sm:$0xff] }
  0xa0   : > { %v665_v52 = vld [vmem:[%s567_s6] sm:$0xff]  ;;  %v3071_v2 = vld [vmem:[#allocation14 + $0x68] sm:$0xff]  ;;  %v3080_v4 = vld [vmem:[#allocation14 + $0x58] sm:$0xff] }
  0xa1   : > { %778 = vmatpush.xpose.msra.mxu2 %v767_v30  ;;  %v2312_v55 = vld [vmem:[%s3502_s7] ss:$0 sm:$0xff]  ;;  %v3084_v5 = vld [vmem:[#allocation14 + $0x50] sm:$0xff]  ;;  %v3089_v6 = vld [vmem:[#allocation14 + $0x48] sm:$0xff]  ;;  %s1823_s6 = scalar_lea.hbm %s3559_s18, %s2182_s24 }
  0xa2   : > { %737 = vmatpush.xpose.msra.mxu1 %v722_v10  ;;  %v2313_v59 = vld [vmem:[%s3500_s5] ss:$0 sm:$0xff]  ;;  %v3101_v10 = vld [vmem:[#allocation14 + $0x38] sm:$0xff] }
  0xa3   : > { %694 = vmatpush.xpose.msra.mxu0 %v679_v11  ;;  %v3075_v3 = vld [vmem:[#allocation14 + $0x60] sm:$0xff] }
  0xa4   : > { %v3093_v8 = vld [vmem:[#allocation14 + $0x40] sm:$0xff] }
  0xa5   : > { %779 = vmatpush.xpose.msra.mxu2 %v766_v33  ;;  %v2314_v9 = vld [vmem:[%s3504_s9] ss:$0 sm:$0xff] }
  0xa6   : > { %738 = vmatpush.xpose.msra.mxu1 %v721_v12  ;;  %v3151_v27 = vld [vmem:[%s577_s25] sm:$0xff] }
  0xa7   : > { %695 = vmatpush.xpose.msra.mxu0 %v678_v13  ;;  %vm798_vm1 = vcmp.eq.s32.totalorder %v3151_v27, 0 }
  0xa9   : > { %780 = vmatpush.xpose.msra.mxu2 %v765_v36 }
  0xaa   : > { %739 = vmatpush.xpose.msra.mxu1 %v720_v14  ;;  %v3109_v14 = vld [vmem:[#allocation14 + $0x30] sm:$0xff] }
  0xab   : > { %696 = vmatpush.xpose.msra.mxu0 %v677_v15  ;;  %v3117_v15 = vld [vmem:[#allocation14 + $0x28] sm:$0xff] }
  0xad   : > { %781 = vmatpush.xpose.msra.mxu2 %v764_v40 }
  0xae   : > { %740 = vmatpush.xpose.msra.mxu1 %v719_v16  ;;  %v3121_v16 = vld [vmem:[#allocation14 + $0x20] sm:$0xff] }
  0xaf   : > { %697 = vmatpush.xpose.msra.mxu0 %v676_v17  ;;  %v3127_v17 = vld [vmem:[#allocation14 + $0x18] sm:$0xff] }
  0xb1   : > { %782 = vmatpush.xpose.msra.mxu2 %v763_v41 }
  0xb2   : > { %741 = vmatpush.xpose.msra.mxu1 %v718_v18  ;;  %v3131_v18 = vld [vmem:[#allocation14 + $0x10] sm:$0xff] }
  0xb3   : > { %698 = vmatpush.xpose.msra.mxu0 %v675_v19  ;;  %v3135_v19 = vld [vmem:[#allocation14 + $0x8] sm:$0xff] }
  0xb5   : > { %783 = vmatpush.xpose.msra.mxu2 %v762_v44 }
  0xb6   : > { %742 = vmatpush.xpose.msra.mxu1 %v717_v20  ;;  %v3139_v20 = vld [vmem:[#allocation14] sm:$0xff] }
  0xb7   : > { %699 = vmatpush.xpose.msra.mxu0 %v674_v21 }
  0xb9   : > { %784 = vmatpush.xpose.msra.mxu2 %v761_v45 }
  0xba   : > { %743 = vmatpush.xpose.msra.mxu1 %v716_v23 }
  0xbb   : > { %700 = vmatpush.xpose.msra.mxu0 %v673_v25 }
  0xbd   : > { %785 = vmatpush.xpose.msra.mxu2 %v760_v46 }
  0xbe   : > { %744 = vmatpush.xpose.msra.mxu1 %v715_v26 }
  0xbf   : > { %701 = vmatpush.xpose.msra.mxu0 %v672_v28 }
  0xc1   : > { %786 = vmatpush.xpose.msra.mxu2 %v759_v47 }
  0xc2   : > { %745 = vmatpush.xpose.msra.mxu1 %v714_v29 }
  0xc3   : > { %702 = vmatpush.xpose.msra.mxu0 %v671_v31 }
  0xc5   : > { %787 = vmatpush.xpose.msra.mxu2 %v758_v48 }
  0xc6   : > { %746 = vmatpush.xpose.msra.mxu1 %v713_v32  ;;  %v3159_v32 = vld [vmem:[%s577_s25 + $0x8] sm:$0xff]  ;;  %s1826_s25 = sshll.u32 %s1823_s6, 4  ;;  %s1827_s25 = int_to_ptr.hbm [resolvable:$true] %s1826_s25 }
  0xc7   : > { %703 = vmatpush.xpose.msra.mxu0 %v670_v34  ;;  %vm799_vm3 = vcmp.eq.s32.totalorder %v3159_v32, 0  ;;  %s2602_s23 = sshra.s32 %s1827_s25, 4  ;;  %s2603_s23 = int_to_ptr.hbm [resolvable:$true] %s2602_s23 }
  0xc8   : > { %s2604_s1 = scalar_lea.hbm %s2603_s23, 64  ;;  %p2609_p2 = scmp.lt.s32.totalorder %s2603_s23, %s3559_s18 }
  0xc9   : > { %788 = vmatpush.xpose.msra.mxu2 %v757_v49  ;;  %p2605_p4 = scmp.ne.s32.totalorder %s2603_s23, %s2604_s1 }
  0xca   : > { %747 = vmatpush.xpose.msra.mxu1 %v712_v35 }
  0xcb   : > { %704 = vmatpush.xpose.msra.mxu0 %v669_v37  ;;  %p2606_p1 = pnand %p2605_p4, %p2869_p3 }
  0xcd   : > { %748 = vmatmul.f32.vlgmr.msra.gmra.mxu1 %v663_v38  ;;  %789 = vmatpush.xpose.msra.mxu2 %v756_v50  ;;  %p2607_p11 = pneg %p2606_p1 }
  0xce   : > { %705 = vmatmul.f32.vlgmr.msra.gmra.mxu0 %v661_v39 }
  0xcf   : > { %2099 = vmatpush.xpose.msk.msrb.mxu0 %vm800_vm0, %v3058_v63 }
  0xd1   : > { %790 = vmatpush.xpose.msra.mxu2 %v755_v51 }
  0xd3   : > { %2100 = vmatpush.xpose.msk.msrb.mxu0 %vm800_vm0, %v3067_v1 }
  0xd4   : > { %791 = vmatmul.f32.vlgmr.msra.gmra.mxu2 %v665_v52 }
  0xd5   : > { %751 = vmatmul.f32.gmra.mxu1 %v664_v42 }
  0xd6   : > { %708 = vmatmul.f32.gmra.mxu0 %v662_v43 }
  0xd7   : > { %2101 = vmatpush.xpose.msk.msrb.mxu0 %vm800_vm0, %v3071_v2 }
  0xdb   : > { %2102 = vmatpush.xpose.msk.msrb.mxu0 %vm800_vm0, %v3075_v3 }
  0xdc   : > { %794 = vmatmul.f32.gmra.mxu2 %v666_v53 }
  0xdf   : > { %2103 = vmatpush.xpose.msk.msrb.mxu0 %vm800_vm0, %v3080_v4 }
  0xe3   : > { %2104 = vmatpush.xpose.msk.msrb.mxu0 %vm800_vm0, %v3084_v5 }
  0xe7   : > { %2105 = vmatpush.xpose.msk.msrb.mxu0 %vm800_vm0, %v3089_v6 }
  0xeb   : > { %2106 = vmatpush.xpose.msk.msrb.mxu0 %vm800_vm0, %v3093_v8 }
  0xef   : > { %2107 = vmatpush.xpose.msk.msrb.mxu0 %vm800_vm0, %v3101_v10 }
  0xf3   : > { %2108 = vmatpush.xpose.msk.msrb.mxu0 %vm800_vm0, %v3109_v14 }
  0xf7   : > { %2109 = vmatpush.xpose.msk.msrb.mxu0 %vm800_vm0, %v3117_v15 }
  0xfb   : > { %2110 = vmatpush.xpose.msk.msrb.mxu0 %vm800_vm0, %v3121_v16 }
  0xff   : > { %2111 = vmatpush.xpose.msk.msrb.mxu0 %vm800_vm0, %v3127_v17 }
 0x103   : > { %2112 = vmatpush.xpose.msk.msrb.mxu0 %vm800_vm0, %v3131_v18 }
 0x107   : > { %2113 = vmatpush.xpose.msk.msrb.mxu0 %vm800_vm0, %v3135_v19 }
 0x10b   : > { %2114 = vmatpush.xpose.msk.msrb.mxu0 %vm800_vm0, %v3139_v20 }
 0x14a   : > { %v749_v54 = vpop.f32.mrf.mxu1 }
 0x14b   : > { %v706_v58 = vpop.f32.mrf.mxu0  ;;  %v750_v60 = vadd.f32 %v2312_v55, %v749_v54 }
 0x14c   : > { %v3052_v61 = vadd.f32 %v2313_v59, %v706_v58 }
 0x152   : > { %v752_v56 = vpop.f32.mrf.mxu1 }
 0x153   : > { %v753_v57 = vadd.f32 %v2312_v55, %v752_v56  ;;  %v709_v62 = vpop.f32.mrf.mxu0 }
 0x154   : > { %v3062_v0 = vadd.f32 %v2313_v59, %v709_v62 }
 0x155   : > { %942 = vrot.lane.b32.xlu2 %v753_v57, %s2714_s11  ;;  %2067 = vmatpush.xpose.msk.msra.mxu3 %vm800_vm0, %v753_v57 }
 0x157   : > { %v792_v7 = vpop.f32.mrf.mxu2 }
 0x158   : > { %v3103_v12 = vadd.f32 %v2314_v9, %v792_v7 }
 0x159   : > { %2068 = vmatpush.xpose.msk.msra.mxu3 %vm800_vm0, %v750_v60 }
 0x15c   : > { %2069 = vmatmul.msk.f32.vlgmr.msra.gmra.mxu3 %vm800_vm0, %v3052_v61 }
 0x15d   : > { %940 = vrot.lane.b32.xlu2 %v750_v60, %s2714_s11 }
 0x15f   : > { %v795_v11 = vpop.f32.mrf.mxu2 }
 0x160   : > { %v3105_v13 = vadd.f32 %v2314_v9, %v795_v11 }
 0x162   : > { %911 = vmatpush.msrb.mxu3 %v3105_v13 }
 0x164   : > { %2070 = vmatmul.msk.f32.gmra.mxu3 %vm800_vm0, %v3062_v0 }
 0x165   : > { %1531 = vrot.lane.b32.xlu2 %v753_v57, %s2715_s15  ;;  %912 = vmatpush.msrb.mxu3 %v3103_v12 }
 0x16d   : > { %1275 = vrot.lane.b32.xlu2 %v753_v57, %s2716_s20 }
 0x175   : > { %1529 = vrot.lane.b32.xlu2 %v750_v60, %s2715_s15 }
 0x17d   : > { %1273 = vrot.lane.b32.xlu2 %v750_v60, %s2716_s20 }
 0x185   : > { %1271 = vrot.lane.b32.xlu2 %v3062_v0, %s2716_s20 }
 0x18d   : > { %1129 = vrot.lane.b32.xlu2 %v3058_v63, %s2714_s11 }
 0x1af   : > { %v943_v21 = vpop.permute.xlu2 %942 }
 0x1b0   : > { %2073 = vmatpush.xpose.msk.msra.mxu3 %vm800_vm0, %v943_v21 }
 0x1b7   : > { %v941_v22 = vpop.permute.xlu2 %940 }
 0x1b8   : > { %2074 = vmatpush.xpose.msk.msra.mxu3 %vm800_vm0, %v941_v22 }
 0x1bf   : > { %v1532_v23 = vpop.permute.xlu2 %1531 }
 0x1c0   : > { %2143 = vmatpush.xpose.msk.msra.mxu0 %vm800_vm0, %v1532_v23 }
 0x1c7   : > { %v1276_v24 = vpop.permute.xlu2 %1275 }
 0x1c8   : > { %2117 = vmatpush.xpose.msk.msrb.mxu1 %vm800_vm0, %v1276_v24 }
 0x1cf   : > { %v1530_v25 = vpop.permute.xlu2 %1529 }
 0x1d0   : > { %2144 = vmatpush.xpose.msk.msra.mxu0 %vm800_vm0, %v1530_v25 }
 0x1d7   : > { %v1274_v26 = vpop.permute.xlu2 %1273 }
 0x1d8   : > { %2118 = vmatpush.xpose.msk.msrb.mxu1 %vm800_vm0, %v1274_v26 }
 0x1df   : > { %v830_v28 = vpop.f32.mrf.mxu3 }
 0x1e0   : > { %v836_v29 = vmul.f32 0.17677669, %v830_v28 }
 0x1e2   : > { %v838_v30 = vsel %vm798_vm1, -1e+09, %v836_v29  ;;  %v1272_v29 = vpop.permute.xlu2 %1271 }
 0x1e3   : > { %v841_v31 = vsel %vm840_vm2, %v838_v30, -inf }
 0x1e4   : > { %842 = vmax.xlane.f32.xlu0 %v841_v31 }
 0x1e7   : > { %v833_v33 = vpop.f32.mrf.mxu3 }
 0x1e8   : > { %v837_v34 = vmul.f32 0.17677669, %v833_v33 }
 0x1ea   : > { %v839_v35 = vsel %vm799_vm3, -1e+09, %v837_v34 }
 0x1eb   : > { %v844_v36 = vsel %vm840_vm2, %v839_v35, -inf }
 0x1ec   : > { %845 = vmax.xlane.f32.xlu0 %v844_v36 }
 0x200   : > { %936 = vrot.lane.b32.xlu0 %v3052_v61, %s2714_s11 }
 0x208   : > { %1525 = vrot.lane.b32.xlu0 %v3052_v61, %s2715_s15 }
 0x210   : > { %1527 = vrot.lane.b32.xlu0 %v3062_v0, %s2715_s15 }
 0x257   : > { %v843_v37 = vpop.xlane.xlu0 %842 }
 0x258   : > { %v847_v38 = vsub.f32 %v838_v30, %v843_v37 }
 0x25a   : > { %v849_v39 = vmul.f32 1.442695, %v847_v38 }
 0x25c   : > { %2316 = vpow2.f32 %v849_v39 }
 0x25f   : > { %v846_v40 = vpop.xlane.xlu0 %845 }
 0x260   : > { %v848_v41 = vsub.f32 %v839_v35, %v846_v40 }
 0x262   : > { %v2317_v42 = vpop.eup %2316  ;;  %v851_v43 = vmul.f32 1.442695, %v848_v41 }
 0x263   : > { %v853_v44 = vsel %vm840_vm2, %v2317_v42, 0.0 }
 0x264   : > { %2318 = vpow2.f32 %v851_v43  ;;  %854 = vadd.xlane.f32.xlu1 %v853_v44  ;;  %v3204_v43 = vpack.i.bf16 %v3103_v12, %v3105_v13 }
 0x26a   : > { %v2319_v45 = vpop.eup %2318 }
 0x26b   : > { %v856_v46 = vsel %vm840_vm2, %v2319_v45, 0.0 }
 0x26c   : > { %857 = vadd.xlane.f32.xlu1 %v856_v46 }
 0x272   : > { %v937_v26 = vpop.permute.xlu0 %936 }
 0x27a   : > { %v1526_v33 = vpop.permute.xlu0 %1525 }
 0x282   : > { %v1528_v38 = vpop.permute.xlu0 %1527 }
 0x285   : > { %938 = vrot.lane.b32.xlu1 %v3062_v0, %s2714_s11 }
 0x28d   : > { %1269 = vrot.lane.b32.xlu1 %v3052_v61, %s2716_s20 }
 0x2d7   : > { %v855_v47 = vpop.xlane.xlu1 %854 }
 0x2d8   : > { %2320 = vrcp.f32 %v855_v47  ;;  %v870_v52 = vand.u32 2147483648, %v855_v47  ;;  %v868_v54 = vand.u32 2147483647, %v855_v47  ;;  %vm864_vm5 = vweird.f32 %v855_v47 }
 0x2da   : > { %v871_v57 = vor.u32 1.1754944e-38, %v870_v52  ;;  %vm869_vm7 = vcmp.eq.f32.partialorder %v868_v54, 8.507059e+37 }
 0x2de   : > { %v2321_v48 = vpop.eup %2320 }
 0x2df   : > { %v860_v49 = vmul.f32 %v2321_v48, %v855_v47  ;;  %v858_v50 = vpop.xlane.xlu1 %857  ;;  %vm865_vm4 = vweird.f32 %v2321_v48 }
 0x2e0   : > { %2322 = vrcp.f32 %v858_v50  ;;  %vm866_vm6 = vmor %vm864_vm5, %vm865_vm4  ;;  %v885_v0 = vand.u32 2147483648, %v858_v50  ;;  %v883_v9 = vand.u32 2147483647, %v858_v50  ;;  %vm879_vm9 = vweird.f32 %v858_v50 }
 0x2e1   : > { %v861_v51 = vsub.f32 1.0, %v860_v49 }
 0x2e2   : > { %v886_v21 = vor.u32 1.1754944e-38, %v885_v0  ;;  %vm884_vm11 = vcmp.eq.f32.partialorder %v883_v9, 8.507059e+37 }
 0x2e3   : > { %v862_v53 = vmul.f32 %v2321_v48, %v861_v51 }
 0x2e5   : > { %v863_v55 = vadd.f32 %v2321_v48, %v862_v53 }
 0x2e6   : > { %v2323_v56 = vpop.eup %2322 }
 0x2e7   : > { %v875_v58 = vmul.f32 %v2323_v56, %v858_v50  ;;  %v867_v59 = vsel %vm866_vm6, %v2321_v48, %v863_v55  ;;  %vm880_vm8 = vweird.f32 %v2323_v56 }
 0x2e8   : > { %v872_v60 = vsel %vm869_vm7, %v871_v57, %v867_v59  ;;  %vm881_vm10 = vmor %vm879_vm9, %vm880_vm8 }
 0x2e9   : > { %v876_v61 = vsub.f32 1.0, %v875_v58  ;;  %v873_v62 = vmul.f32 %v2317_v42, %v872_v60 }
 0x2eb   : > { %v877_v7 = vmul.f32 %v2323_v56, %v876_v61  ;;  %889 = vst.msk [vmem:[%s3178_s13] sm:$0xff] %vm840_vm2, %v873_v62  ;;  %2071 = vmatmul.msk.f32.vlgmr.msrb.gmra.mxu3 %vm840_vm2, %v873_v62 }
 0x2ed   : > { %v878_v11 = vadd.f32 %v2323_v56, %v877_v7  ;;  %v1130_v7 = vpop.permute.xlu2 %1129 }
 0x2ef   : > { %v882_v22 = vsel %vm881_vm10, %v2323_v56, %v878_v11 }
 0x2f0   : > { %v887_v23 = vsel %vm884_vm11, %v886_v21, %v882_v22 }
 0x2f1   : > { %v888_v24 = vmul.f32 %v2319_v45, %v887_v23 }
 0x2f3   : > { %890 = vst.msk [vmem:[%s3178_s13 + $0x8] sm:$0xff] %vm840_vm2, %v888_v24  ;;  %2072 = vmatmul.msk.f32.gmra.mxu3 %vm840_vm2, %v888_v24 }
 0x2f7   : > { %v939_v25 = vpop.permute.xlu1 %938 }
 0x2fb   : > { %2075 = vmatmul.msk.f32.vlgmr.msra.gmra.mxu3 %vm800_vm0, %v937_v26 }
 0x2ff   : > { %v1270_v28 = vpop.permute.xlu1 %1269 }
 0x300   : > { %2119 = vmatmul.msk.f32.vlgmr.msrb.gmra.mxu1 %vm800_vm0, %v1270_v28 }
 0x303   : > { %2076 = vmatmul.msk.f32.gmra.mxu3 %vm800_vm0, %v939_v25 }
 0x308   : > { %2120 = vmatmul.msk.f32.gmra.mxu1 %vm800_vm0, %v1272_v29 }
 0x36e   : > { %v914_v30 = vpop.f32.mrf.mxu3 }
 0x36f   : > { %2115 = vmatmul.msk.f32.vlgmr.msrb.gmra.mxu0 %vm800_vm0, %v914_v30 }
 0x376   : > { %v917_v31 = vpop.f32.mrf.mxu3 }
 0x377   : > { %2116 = vmatmul.msk.f32.gmra.mxu0 %vm800_vm0, %v917_v31 }
 0x37d   : > { %v1302_v44 = vpop.f32.mrf.mxu1 }
 0x37e   : > { %v969_v34 = vpop.f32.mrf.mxu3  ;;  %v1308_v45 = vmul.f32 0.17677669, %v1302_v44 }
 0x37f   : > { %v975_v35 = vmul.f32 0.17677669, %v969_v34  ;;  %2145 = vmatmul.msk.f32.vlgmr.msra.gmra.mxu0 %vm800_vm0, %v1526_v33 }
 0x380   : > { %v3210_v46 = vsel %vm798_vm1, -1e+09, %v1308_v45 }
 0x381   : > { %v977_v36 = vsel %vm798_vm1, -1e+09, %v975_v35  ;;  %v1312_v47 = vsel %vm840_vm2, %v3210_v46, -inf }
 0x382   : > { %v979_v37 = vsel %vm840_vm2, %v977_v36, -inf }
 0x383   : > { %980 = vmax.xlane.f32.xlu1 %v979_v37 }
 0x385   : > { %v1305_v23 = vpop.f32.mrf.mxu1 }
 0x386   : > { %v972_v39 = vpop.f32.mrf.mxu3  ;;  %v1309_v25 = vmul.f32 0.17677669, %v1305_v23 }
 0x387   : > { %v976_v40 = vmul.f32 0.17677669, %v972_v39  ;;  %2146 = vmatmul.msk.f32.gmra.mxu0 %vm800_vm0, %v1528_v38 }
 0x388   : > { %v3253_v26 = vsel %vm799_vm3, -1e+09, %v1309_v25 }
 0x389   : > { %v978_v41 = vsel %vm799_vm3, -1e+09, %v976_v40  ;;  %v1315_v28 = vsel %vm840_vm2, %v3253_v26, -inf }
 0x38a   : > { %v982_v42 = vsel %vm840_vm2, %v978_v41, -inf }
 0x38b   : > { %983 = vmax.xlane.f32.xlu0 %v982_v42 }
 0x39c   : > { %1127 = vrot.lane.b32.xlu1 %v3067_v1, %s2714_s11 }
 0x39f   : > { %2298 = vrot.lane.b32.xlu0 %v3204_v43, %s2714_s11 }
 0x3c9   : > { %1313 = vmax.xlane.f32.xlu0 %v1312_v47 }
 0x3dd   : > { %1121 = vrot.lane.b32.xlu0 %v3080_v4, %s2714_s11 }
 0x3e5   : > { %1117 = vrot.lane.b32.xlu0 %v3089_v6, %s2714_s11 }
 0x3ec   : > { %v3218_v12 = vpop.f32.mrf.mxu0 }
 0x3ed   : > { %1113 = vrot.lane.b32.xlu0 %v3101_v10, %s2714_s11 }
 0x3f4   : > { %v3222_v13 = vpop.f32.mrf.mxu0 }
 0x3f5   : > { %1111 = vrot.lane.b32.xlu0 %v3109_v14, %s2714_s11 }
 0x3f6   : > { %v981_v48 = vpop.xlane.xlu1 %980 }
 0x3f7   : > { %v985_v49 = vsub.f32 %v977_v36, %v981_v48 }
 0x3f9   : > { %v987_v50 = vmul.f32 1.442695, %v985_v49 }
 0x3fb   : > { %2324 = vpow2.f32 %v987_v50 }
 0x3fc   : > { %v1558_v51 = vpop.f32.mrf.mxu0 }
 0x3fd   : > { %v1564_v52 = vmul.f32 0.17677669, %v1558_v51  ;;  %1107 = vrot.lane.b32.xlu0 %v3121_v16, %s2714_s11 }
 0x3fe   : > { %v984_v53 = vpop.xlane.xlu0 %983 }
 0x3ff   : > { %v986_v54 = vsub.f32 %v978_v41, %v984_v53  ;;  %v1566_v55 = vsel %vm798_vm1, -1e+09, %v1564_v52 }
 0x400   : > { %v1568_v56 = vsel %vm840_vm2, %v1566_v55, -inf }
 0x401   : > { %v3231_v57 = vpop.eup %2324  ;;  %v989_v58 = vmul.f32 1.442695, %v986_v54  ;;  %1569 = vmax.xlane.f32.xlu1 %v1568_v56 }
 0x402   : > { %v991_v59 = vsel %vm840_vm2, %v3231_v57, 0.0 }
 0x403   : > { %2326 = vpow2.f32 %v989_v58  ;;  %992 = vadd.xlane.f32.xlu2 %v991_v59 }
 0x404   : > { %v1561_v11 = vpop.f32.mrf.mxu0 }
 0x405   : > { %v1565_v21 = vmul.f32 0.17677669, %v1561_v11 }
 0x407   : > { %v3247_v22 = vsel %vm799_vm3, -1e+09, %v1565_v21 }
 0x408   : > { %v1571_v24 = vsel %vm840_vm2, %v3247_v22, -inf }
 0x409   : > { %v3235_v60 = vpop.eup %2326 }
 0x40a   : > { %v994_v61 = vsel %vm840_vm2, %v3235_v60, 0.0 }
 0x40b   : > { %995 = vadd.xlane.f32.xlu1 %v994_v61 }
 0x40e   : > { %v1128_v9 = vpop.permute.xlu1 %1127 }
 0x411   : > { %v2299_v62 = vpop.permute.xlu0 %2298 }
 0x412   : > { %v2300_v27 = vunpack.i.l.bf16 %v2299_v62  ;;  %v2301_v0 = vunpack.i.h.bf16 %v2299_v62 }
 0x414   : > { %1058 = vmatpush.msrb.mxu3 %v2300_v27 }
 0x416   : > { %1059 = vmatpush.msrb.mxu3 %v2301_v0 }
 0x418   : > { %2081 = vmatpush.xpose.msk.msra.mxu3 %vm800_vm0, %v1130_v7 }
 0x41b   : > { %1125 = vrot.lane.b32.xlu2 %v3071_v2, %s2714_s11 }
 0x41c   : > { %2082 = vmatpush.xpose.msk.msra.mxu3 %vm800_vm0, %v1128_v9 }
 0x424   : > { %1123 = vrot.lane.b32.xlu1 %v3075_v3, %s2714_s11 }
 0x43c   : > { %v1314_v44 = vpop.xlane.xlu0 %1313 }
 0x43d   : > { %v1318_v51 = vsub.f32 %v3210_v46, %v1314_v44 }
 0x43f   : > { %v1320_v59 = vmul.f32 1.442695, %v1318_v51 }
 0x444   : > { %1572 = vmax.xlane.f32.xlu2 %v1571_v24 }
 0x44e   : > { %1316 = vmax.xlane.f32.xlu1 %v1315_v28 }
 0x44f   : > { %v1122_v11 = vpop.permute.xlu0 %1121 }
 0x45c   : > { %1119 = vrot.lane.b32.xlu2 %v3084_v5, %s2714_s11 }
 0x464   : > { %1109 = vrot.lane.b32.xlu2 %v3117_v15, %s2714_s11 }
 0x467   : > { %1115 = vrot.lane.b32.xlu1 %v3093_v8, %s2714_s11 }
 0x46c   : > { %1105 = vrot.lane.b32.xlu2 %v3127_v17, %s2714_s11 }
 0x46f   : > { %1103 = vrot.lane.b32.xlu1 %v3131_v18, %s2714_s11 }
 0x474   : > { %v1570_v32 = vpop.xlane.xlu1 %1569  ;;  %1101 = vrot.lane.b32.xlu2 %v3135_v19, %s2714_s11 }
 0x475   : > { %v1574_v29 = vsub.f32 %v1566_v55, %v1570_v32 }
 0x476   : > { %v993_v30 = vpop.xlane.xlu2 %992 }
 0x477   : > { %v1576_v31 = vmul.f32 1.442695, %v1574_v29  ;;  %2328 = vrcp.f32 %v993_v30  ;;  %v1008_v40 = vand.u32 2147483648, %v993_v30  ;;  %v1006_v42 = vand.u32 2147483647, %v993_v30 }
 0x478   : > { %vm1002_vm13 = vweird.f32 %v993_v30 }
 0x479   : > { %2330 = vpow2.f32 %v1576_v31  ;;  %v1009_v48 = vor.u32 1.1754944e-38, %v1008_v40  ;;  %vm1007_vm15 = vcmp.eq.f32.partialorder %v1006_v42, 8.507059e+37 }
 0x47c   : > { %1099 = vrot.lane.b32.xlu2 %v3139_v20, %s2714_s11 }
 0x47d   : > { %v2329_v33 = vpop.eup %2328 }
 0x47e   : > { %v998_v34 = vmul.f32 %v2329_v33, %v993_v30  ;;  %v996_v35 = vpop.xlane.xlu1 %995  ;;  %v1126_v36 = vpop.permute.xlu2 %1125  ;;  %vm1003_vm12 = vweird.f32 %v2329_v33 }
 0x47f   : > { %v3271_v37 = vpop.eup %2330  ;;  %2332 = vrcp.f32 %v996_v35  ;;  %2083 = vmatpush.xpose.msk.msra.mxu3 %vm800_vm0, %v1126_v36  ;;  %vm1004_vm14 = vmor %vm1002_vm13, %vm1003_vm12  ;;  %v1023_v55 = vand.u32 2147483648, %v996_v35  ;;  %v1021_v58 = vand.u32 2147483647, %v996_v35  ;;  %vm1017_vm3 = vweird.f32 %v996_v35 }
 0x480   : > { %v999_v38 = vsub.f32 1.0, %v998_v34  ;;  %v1580_v39 = vsel %vm840_vm2, %v3271_v37, 0.0  ;;  %2334 = vpow2.f32 %v1320_v59 }
 0x481   : > { %1581 = vadd.xlane.f32.xlu0 %v1580_v39  ;;  %v1024_v62 = vor.u32 1.1754944e-38, %v1023_v55  ;;  %vm1022_vm5 = vcmp.eq.f32.partialorder %v1021_v58, 8.507059e+37 }
 0x482   : > { %v1000_v41 = vmul.f32 %v2329_v33, %v999_v38 }
 0x484   : > { %v1001_v45 = vadd.f32 %v2329_v33, %v1000_v41 }
 0x485   : > { %v2333_v47 = vpop.eup %2332 }
 0x486   : > { %v1005_v49 = vsel %vm1004_vm14, %v2329_v33, %v1001_v45  ;;  %v1013_v50 = vmul.f32 %v2333_v47, %v996_v35  ;;  %vm1018_vm1 = vweird.f32 %v2333_v47  ;;  %v3285_v0 = vpop.eup %2334 }
 0x487   : > { %v1010_v52 = vsel %vm1007_vm15, %v1009_v48, %v1005_v49  ;;  %vm1019_vm4 = vmor %vm1017_vm3, %vm1018_vm1  ;;  %v1324_v9 = vsel %vm840_vm2, %v3285_v0, 0.0 }
 0x488   : > { %v1014_v53 = vsub.f32 1.0, %v1013_v50  ;;  %v1011_v54 = vmul.f32 %v3231_v57, %v1010_v52 }
 0x48a   : > { %v1015_v56 = vmul.f32 %v2333_v47, %v1014_v53  ;;  %2077 = vst.msk [vmem:[%s3178_s13 + $0x10] sm:$0xff] %vm840_vm2, %v1011_v54  ;;  %2079 = vmatmul.msk.f32.vlgmr.msrb.gmra.mxu3 %vm840_vm2, %v1011_v54 }
 0x48c   : > { %v1016_v61 = vadd.f32 %v2333_v47, %v1015_v56 }
 0x48e   : > { %v1020_v27 = vsel %vm1019_vm4, %v2333_v47, %v1016_v61 }
 0x48f   : > { %v1025_v46 = vsel %vm1022_vm5, %v1024_v62, %v1020_v27 }
 0x490   : > { %v1026_v57 = vmul.f32 %v3235_v60, %v1025_v46 }
 0x492   : > { %2078 = vst.msk [vmem:[%s3178_s13 + $0x18] sm:$0xff] %vm840_vm2, %v1026_v57  ;;  %2080 = vmatmul.msk.f32.gmra.mxu3 %vm840_vm2, %v1026_v57 }
 0x496   : > { %v1124_v7 = vpop.permute.xlu1 %1123 }
 0x497   : > { %2084 = vmatpush.xpose.msk.msra.mxu3 %vm800_vm0, %v1124_v7 }
 0x499   : > { %1325 = vadd.xlane.f32.xlu1 %v1324_v9 }
 0x49b   : > { %2085 = vmatpush.xpose.msk.msra.mxu3 %vm800_vm0, %v1122_v11 }
 0x4b2   : > { %2303 = vrot.lane.b32.xlu1 %v3204_v43, %s2715_s15 }
 0x4b7   : > { %v1573_v60 = vpop.xlane.xlu2 %1572 }
 0x4b8   : > { %v1575_v21 = vsub.f32 %v3247_v22, %v1573_v60  ;;  %v1118_v22 = vpop.permute.xlu0 %1117 }
 0x4ba   : > { %v1578_v23 = vmul.f32 1.442695, %v1575_v21  ;;  %1714 = vrot.lane.b32.xlu1 %v3067_v1, %s2715_s15 }
 0x4bc   : > { %2336 = vpow2.f32 %v1578_v23 }
 0x4bf   : > { %v1120_v24 = vpop.permute.xlu2 %1119 }
 0x4c0   : > { %2086 = vmatpush.xpose.msk.msra.mxu3 %vm800_vm0, %v1120_v24  ;;  %v1114_v33 = vpop.permute.xlu0 %1113 }
 0x4c1   : > { %v1317_v25 = vpop.xlane.xlu1 %1316 }
 0x4c2   : > { %v3297_v28 = vpop.eup %2336  ;;  %v1319_v32 = vsub.f32 %v3253_v26, %v1317_v25  ;;  %1712 = vrot.lane.b32.xlu1 %v3071_v2, %s2715_s15 }
 0x4c3   : > { %v1583_v29 = vsel %vm840_vm2, %v3297_v28, 0.0 }
 0x4c4   : > { %v1322_v30 = vmul.f32 1.442695, %v1319_v32  ;;  %1584 = vadd.xlane.f32.xlu2 %v1583_v29  ;;  %2087 = vmatpush.xpose.msk.msra.mxu3 %vm800_vm0, %v1118_v22 }
 0x4c6   : > { %2338 = vpow2.f32 %v1322_v30 }
 0x4c7   : > { %v1110_v35 = vpop.permute.xlu2 %1109 }
 0x4c8   : > { %v1112_v36 = vpop.permute.xlu0 %1111 }
 0x4ca   : > { %1454 = vrot.lane.b32.xlu1 %v3075_v3, %s2716_s20 }
 0x4cc   : > { %v3307_v31 = vpop.eup %2338 }
 0x4cd   : > { %v1327_v26 = vsel %vm840_vm2, %v3307_v31, 0.0 }
 0x4ce   : > { %1328 = vadd.xlane.f32.xlu0 %v1327_v26 }
 0x4cf   : > { %v1106_v38 = vpop.permute.xlu2 %1105 }
 0x4d0   : > { %v1108_v39 = vpop.permute.xlu0 %1107 }
 0x4d2   : > { %1706 = vrot.lane.b32.xlu1 %v3084_v5, %s2715_s15 }
 0x4d9   : > { %v1116_v34 = vpop.permute.xlu1 %1115 }
 0x4da   : > { %2088 = vmatpush.xpose.msk.msra.mxu3 %vm800_vm0, %v1116_v34  ;;  %1448 = vrot.lane.b32.xlu1 %v3089_v6, %s2716_s20 }
 0x4dc   : > { %1716 = vrot.lane.b32.xlu2 %v3058_v63, %s2715_s15 }
 0x4de   : > { %2089 = vmatpush.xpose.msk.msra.mxu3 %vm800_vm0, %v1114_v33 }
 0x4e1   : > { %v1104_v40 = vpop.permute.xlu1 %1103 }
 0x4e2   : > { %2308 = vrot.lane.b32.xlu0 %v3204_v43, %s2716_s20  ;;  %2090 = vmatpush.xpose.msk.msra.mxu3 %vm800_vm0, %v1112_v36  ;;  %v1102_v43 = vpop.permute.xlu2 %1101 }
 0x4e3   : > { %1700 = vrot.lane.b32.xlu1 %v3101_v10, %s2715_s15 }
 0x4e4   : > { %1456 = vrot.lane.b32.xlu2 %v3071_v2, %s2716_s20 }
 0x4e6   : > { %2091 = vmatpush.xpose.msk.msra.mxu3 %vm800_vm0, %v1110_v35 }
 0x4ea   : > { %1460 = vrot.lane.b32.xlu0 %v3058_v63, %s2716_s20  ;;  %2092 = vmatpush.xpose.msk.msra.mxu3 %vm800_vm0, %v1108_v39  ;;  %v1100_v2 = vpop.permute.xlu2 %1099 }
 0x4eb   : > { %1442 = vrot.lane.b32.xlu1 %v3109_v14, %s2716_s20 }
 0x4ec   : > { %1708 = vrot.lane.b32.xlu2 %v3080_v4, %s2715_s15 }
 0x4ee   : > { %2093 = vmatpush.xpose.msk.msra.mxu3 %vm800_vm0, %v1106_v38 }
 0x4f2   : > { %1458 = vrot.lane.b32.xlu0 %v3067_v1, %s2716_s20  ;;  %2094 = vmatpush.xpose.msk.msra.mxu3 %vm800_vm0, %v1104_v40 }
 0x4f3   : > { %1694 = vrot.lane.b32.xlu1 %v3121_v16, %s2715_s15 }
 0x4f4   : > { %v1582_v63 = vpop.xlane.xlu0 %1581  ;;  %1450 = vrot.lane.b32.xlu2 %v3084_v5, %s2716_s20 }
 0x4f5   : > { %2340 = vrcp.f32 %v1582_v63  ;;  %v1597_v5 = vand.u32 2147483648, %v1582_v63  ;;  %v1595_v45 = vand.u32 2147483647, %v1582_v63  ;;  %vm1591_vm7 = vweird.f32 %v1582_v63 }
 0x4f6   : > { %2095 = vmatpush.xpose.msk.msra.mxu3 %vm800_vm0, %v1102_v43 }
 0x4f7   : > { %vm1596_vm9 = vcmp.eq.f32.partialorder %v1595_v45, 8.507059e+37 }
 0x4fa   : > { %1710 = vrot.lane.b32.xlu0 %v3075_v3, %s2715_s15  ;;  %2096 = vmatpush.xpose.msk.msra.mxu3 %vm800_vm0, %v1100_v2  ;;  %v1598_v3 = vor.u32 1.1754944e-38, %v1597_v5 }
 0x4fb   : > { %v2341_v41 = vpop.eup %2340  ;;  %1436 = vrot.lane.b32.xlu1 %v3127_v17, %s2716_s20 }
 0x4fc   : > { %v1587_v1 = vmul.f32 %v2341_v41, %v1582_v63  ;;  %1702 = vrot.lane.b32.xlu2 %v3093_v8, %s2715_s15  ;;  %vm1592_vm6 = vweird.f32 %v2341_v41 }
 0x4fd   : > { %vm1593_vm8 = vmor %vm1591_vm7, %vm1592_vm6 }
 0x4fe   : > { %v1588_v42 = vsub.f32 1.0, %v1587_v1 }
 0x500   : > { %v1589_v44 = vmul.f32 %v2341_v41, %v1588_v42 }
 0x502   : > { %v1590_v47 = vadd.f32 %v2341_v41, %v1589_v44  ;;  %1452 = vrot.lane.b32.xlu0 %v3080_v4, %s2716_s20 }
 0x503   : > { %1688 = vrot.lane.b32.xlu1 %v3135_v19, %s2715_s15 }
 0x504   : > { %v1594_v48 = vsel %vm1593_vm8, %v2341_v41, %v1590_v47  ;;  %1444 = vrot.lane.b32.xlu2 %v3101_v10, %s2716_s20 }
 0x505   : > { %v1599_v49 = vsel %vm1596_vm9, %v1598_v3, %v1594_v48 }
 0x506   : > { %v1600_v50 = vmul.f32 %v3271_v37, %v1599_v49 }
 0x508   : > { %2147 = vst.msk [vmem:[%s3178_s13 + $0x30] sm:$0xff] %vm840_vm2, %v1600_v50 }
 0x50a   : > { %1704 = vrot.lane.b32.xlu0 %v3089_v6, %s2715_s15 }
 0x50b   : > { %1430 = vrot.lane.b32.xlu1 %v3139_v20, %s2716_s20 }
 0x50c   : > { %v1326_v4 = vpop.xlane.xlu1 %1325  ;;  %1696 = vrot.lane.b32.xlu2 %v3117_v15, %s2715_s15 }
 0x50d   : > { %2342 = vrcp.f32 %v1326_v4  ;;  %v1061_v51 = vpop.f32.mrf.mxu3  ;;  %v1341_v53 = vand.u32 2147483648, %v1326_v4  ;;  %v1339_v55 = vand.u32 2147483647, %v1326_v4  ;;  %vm1335_vm11 = vweird.f32 %v1326_v4 }
 0x50e   : > { %2097 = vmatmul.msk.f32.vlgmr.msra.gmra.mxu3 %vm800_vm0, %v1061_v51 }
 0x50f   : > { %vm1340_vm13 = vcmp.eq.f32.partialorder %v1339_v55, 8.507059e+37 }
 0x512   : > { %1446 = vrot.lane.b32.xlu0 %v3093_v8, %s2716_s20  ;;  %v1342_v8 = vor.u32 1.1754944e-38, %v1341_v53 }
 0x513   : > { %v2343_v10 = vpop.eup %2342 }
 0x514   : > { %v1331_v37 = vmul.f32 %v2343_v10, %v1326_v4  ;;  %1438 = vrot.lane.b32.xlu2 %v3121_v16, %s2716_s20  ;;  %vm1336_vm10 = vweird.f32 %v2343_v10 }
 0x515   : > { %v1064_v6 = vpop.f32.mrf.mxu3  ;;  %vm1337_vm12 = vmor %vm1335_vm11, %vm1336_vm10 }
 0x516   : > { %v1332_v52 = vsub.f32 1.0, %v1331_v37  ;;  %2098 = vmatmul.msk.f32.gmra.mxu3 %vm800_vm0, %v1064_v6 }
 0x518   : > { %v1333_v54 = vmul.f32 %v2343_v10, %v1332_v52 }
 0x51a   : > { %v1334_v56 = vadd.f32 %v2343_v10, %v1333_v54  ;;  %1698 = vrot.lane.b32.xlu0 %v3109_v14, %s2715_s15 }
 0x51c   : > { %v1338_v58 = vsel %vm1337_vm12, %v2343_v10, %v1334_v56  ;;  %1690 = vrot.lane.b32.xlu2 %v3131_v18, %s2715_s15 }
 0x51d   : > { %v1343_v16 = vsel %vm1340_vm13, %v1342_v8, %v1338_v58 }
 0x51e   : > { %v1344_v59 = vmul.f32 %v3285_v0, %v1343_v16 }
 0x520   : > { %2121 = vst.msk [vmem:[%s3178_s13 + $0x20] sm:$0xff] %vm840_vm2, %v1344_v59 }
 0x522   : > { %1440 = vrot.lane.b32.xlu0 %v3117_v15, %s2716_s20 }
 0x524   : > { %v2304_v61 = vpop.permute.xlu1 %2303  ;;  %1432 = vrot.lane.b32.xlu2 %v3135_v19, %s2716_s20 }
 0x525   : > { %v2305_v14 = vunpack.i.l.bf16 %v2304_v61  ;;  %v2306_v62 = vunpack.i.h.bf16 %v2304_v61 }
 0x527   : > { %1645 = vmatpush.msrb.mxu2 %v2305_v14 }
 0x529   : > { %1646 = vmatpush.msrb.mxu2 %v2306_v62 }
 0x52a   : > { %1692 = vrot.lane.b32.xlu0 %v3127_v17, %s2715_s15  ;;  %2149 = vmatmul.msk.f32.vlgmr.msrb.gmra.mxu2 %vm840_vm2, %v1600_v50 }
 0x52c   : > { %v1715_v0 = vpop.permute.xlu1 %1714 }
 0x532   : > { %1434 = vrot.lane.b32.xlu0 %v3131_v18, %s2716_s20 }
 0x534   : > { %v1713_v29 = vpop.permute.xlu1 %1712 }
 0x537   : > { %v1585_v27 = vpop.xlane.xlu2 %1584 }
 0x538   : > { %2344 = vrcp.f32 %v1585_v27  ;;  %v1612_v7 = vand.u32 2147483648, %v1585_v27  ;;  %v1610_v17 = vand.u32 2147483647, %v1585_v27  ;;  %vm1606_vm15 = vweird.f32 %v1585_v27 }
 0x53a   : > { %1686 = vrot.lane.b32.xlu0 %v3139_v20, %s2715_s15  ;;  %v1613_v60 = vor.u32 1.1754944e-38, %v1612_v7  ;;  %vm1611_vm3 = vcmp.eq.f32.partialorder %v1610_v17, 8.507059e+37  ;;  %s2608_s15 = scalar_lea.hbm %s3559_s18, 128 }
 0x53b   : > { %p2610_p10 = scmp.lt.s32.totalorder %s2608_s15, %s2604_s1 }
 0x53c   : > { %v1455_v2 = vpop.permute.xlu1 %1454 }
 0x53d   : > { %p2611_p13 = por %p2610_p10, %p2609_p2 }
 0x53e   : > { %v2345_v15 = vpop.eup %2344 }
 0x53f   : > { %v1602_v46 = vmul.f32 %v2345_v15, %v1585_v27  ;;  %v1717_v9 = vpop.permute.xlu2 %1716  ;;  %vm1607_vm14 = vweird.f32 %v2345_v15  ;;  %p2612_p8 = pnand %p2611_p13, %p2607_p11 }
 0x540   : > { %2151 = vmatpush.xpose.msk.msra.mxu2 %vm800_vm0, %v1717_v9  ;;  %vm1608_vm1 = vmor %vm1606_vm15, %vm1607_vm14 }
 0x541   : > { %v1603_v19 = vsub.f32 1.0, %v1602_v46  ;;  %v1329_v57 = vpop.xlane.xlu0 %1328 }
 0x542   : > { %2346 = vrcp.f32 %v1329_v57  ;;  %v1356_v22 = vand.u32 2147483648, %v1329_v57  ;;  %v1354_v26 = vand.u32 2147483647, %v1329_v57  ;;  %vm1350_vm5 = vweird.f32 %v1329_v57 }
 0x543   : > { %v1604_v11 = vmul.f32 %v2345_v15, %v1603_v19 }
 0x544   : > { %2152 = vmatpush.xpose.msk.msra.mxu2 %vm800_vm0, %v1715_v0  ;;  %v1357_v34 = vor.u32 1.1754944e-38, %v1356_v22  ;;  %vm1355_vm7 = vcmp.eq.f32.partialorder %v1354_v26, 8.507059e+37 }
 0x545   : > { %v1605_v18 = vadd.f32 %v2345_v15, %v1604_v11 }
 0x547   : > { %v1609_v21 = vsel %vm1608_vm1, %v2345_v15, %v1605_v18  ;;  %v1457_v40 = vpop.permute.xlu2 %1456 }
 0x548   : > { %v2347_v20 = vpop.eup %2346  ;;  %v1614_v23 = vsel %vm1611_vm3, %v1613_v60, %v1609_v21  ;;  %2153 = vmatpush.xpose.msk.msra.mxu2 %vm800_vm0, %v1713_v29 }
 0x549   : > { %v1346_v24 = vmul.f32 %v2347_v20, %v1329_v57  ;;  %v1615_v25 = vmul.f32 %v3297_v28, %v1614_v23  ;;  %vm1351_vm4 = vweird.f32 %v2347_v20 }
 0x54a   : > { %vm1352_vm6 = vmor %vm1350_vm5, %vm1351_vm4 }
 0x54b   : > { %v1347_v32 = vsub.f32 1.0, %v1346_v24  ;;  %2148 = vst.msk [vmem:[%s3178_s13 + $0x38] sm:$0xff] %vm840_vm2, %v1615_v25  ;;  %2150 = vmatmul.msk.f32.gmra.mxu2 %vm840_vm2, %v1615_v25 }
 0x54d   : > { %v1348_v30 = vmul.f32 %v2347_v20, %v1347_v32 }
 0x54f   : > { %v1349_v33 = vadd.f32 %v2347_v20, %v1348_v30  ;;  %v1709_v41 = vpop.permute.xlu2 %1708 }
 0x551   : > { %v1353_v35 = vsel %vm1352_vm6, %v2347_v20, %v1349_v33 }
 0x552   : > { %v1358_v28 = vsel %vm1355_vm7, %v1357_v34, %v1353_v35 }
 0x553   : > { %v1359_v36 = vmul.f32 %v3307_v31, %v1358_v28  ;;  %v1707_v31 = vpop.permute.xlu1 %1706 }
 0x554   : > { %v2309_v38 = vpop.permute.xlu0 %2308 }
 0x555   : > { %v2310_v39 = vunpack.i.l.bf16 %v2309_v38  ;;  %2122 = vst.msk [vmem:[%s3178_s13 + $0x28] sm:$0xff] %vm840_vm2, %v1359_v36  ;;  %v2311_v43 = vunpack.i.h.bf16 %v2309_v38 }
 0x557   : > { %1389 = vmatpush.msrb.mxu3 %v2310_v39  ;;  %v1451_v5 = vpop.permute.xlu2 %1450 }
 0x559   : > { %1390 = vmatpush.msrb.mxu3 %v2311_v43 }
 0x55a   : > { %2123 = vmatmul.msk.f32.vlgmr.msrb.gmra.mxu3 %vm840_vm2, %v1344_v59 }
 0x55b   : > { %v1449_v44 = vpop.permute.xlu1 %1448 }
 0x55c   : > { %v1461_v63 = vpop.permute.xlu0 %1460 }
 0x55d   : > { %2125 = vmatpush.xpose.msk.msra.mxu1 %vm800_vm0, %v1461_v63 }
 0x55f   : > { %v1703_v47 = vpop.permute.xlu2 %1702 }
 0x562   : > { %2124 = vmatmul.msk.f32.gmra.mxu3 %vm840_vm2, %v1359_v36 }
 0x563   : > { %v1701_v3 = vpop.permute.xlu1 %1700 }
 0x564   : > { %v1459_v1 = vpop.permute.xlu0 %1458 }
 0x565   : > { %2126 = vmatpush.xpose.msk.msra.mxu1 %vm800_vm0, %v1459_v1 }
 0x567   : > { %v1445_v49 = vpop.permute.xlu2 %1444 }
 0x569   : > { %2127 = vmatpush.xpose.msk.msra.mxu1 %vm800_vm0, %v1457_v40 }
 0x56b   : > { %v1443_v4 = vpop.permute.xlu1 %1442 }
 0x56c   : > { %v1711_v42 = vpop.permute.xlu0 %1710 }
 0x56d   : > { %2154 = vmatpush.xpose.msk.msra.mxu2 %vm800_vm0, %v1711_v42  ;;  %2128 = vmatpush.xpose.msk.msra.mxu1 %vm800_vm0, %v1455_v2 }
 0x56f   : > { %v1697_v51 = vpop.permute.xlu2 %1696 }
 0x571   : > { %2155 = vmatpush.xpose.msk.msra.mxu2 %vm800_vm0, %v1709_v41 }
 0x573   : > { %v1695_v37 = vpop.permute.xlu1 %1694 }
 0x574   : > { %v1453_v45 = vpop.permute.xlu0 %1452 }
 0x575   : > { %2156 = vmatpush.xpose.msk.msra.mxu2 %vm800_vm0, %v1707_v31  ;;  %2129 = vmatpush.xpose.msk.msra.mxu1 %vm800_vm0, %v1453_v45 }
 0x577   : > { %v1439_v52 = vpop.permute.xlu2 %1438 }
 0x579   : > { %2130 = vmatpush.xpose.msk.msra.mxu1 %vm800_vm0, %v1451_v5 }
 0x57b   : > { %v1437_v53 = vpop.permute.xlu1 %1436 }
 0x57c   : > { %v1705_v48 = vpop.permute.xlu0 %1704 }
 0x57d   : > { %2157 = vmatpush.xpose.msk.msra.mxu2 %vm800_vm0, %v1705_v48  ;;  %2131 = vmatpush.xpose.msk.msra.mxu1 %vm800_vm0, %v1449_v44 }
 0x57f   : > { %v1691_v55 = vpop.permute.xlu2 %1690 }
 0x581   : > { %2158 = vmatpush.xpose.msk.msra.mxu2 %vm800_vm0, %v1703_v47 }
 0x583   : > { %v1689_v56 = vpop.permute.xlu1 %1688 }
 0x584   : > { %v1447_v50 = vpop.permute.xlu0 %1446 }
 0x585   : > { %2159 = vmatpush.xpose.msk.msra.mxu2 %vm800_vm0, %v1701_v3  ;;  %2132 = vmatpush.xpose.msk.msra.mxu1 %vm800_vm0, %v1447_v50 }
 0x587   : > { %v1433_v59 = vpop.permute.xlu2 %1432 }
 0x589   : > { %2133 = vmatpush.xpose.msk.msra.mxu1 %vm800_vm0, %v1445_v49 }
 0x58b   : > { %v1431_v61 = vpop.permute.xlu1 %1430 }
 0x58c   : > { %v1699_v10 = vpop.permute.xlu0 %1698 }
 0x58d   : > { %2160 = vmatpush.xpose.msk.msra.mxu2 %vm800_vm0, %v1699_v10  ;;  %2134 = vmatpush.xpose.msk.msra.mxu1 %vm800_vm0, %v1443_v4 }
 0x591   : > { %2161 = vmatpush.xpose.msk.msra.mxu2 %vm800_vm0, %v1697_v51  ;;  %v1186_v14 = vpop.f32.mrf.mxu3 }
 0x594   : > { %v1441_v6 = vpop.permute.xlu0 %1440 }
 0x595   : > { %2162 = vmatpush.xpose.msk.msra.mxu2 %vm800_vm0, %v1695_v37  ;;  %2135 = vmatpush.xpose.msk.msra.mxu1 %vm800_vm0, %v1441_v6 }
 0x599   : > { %2136 = vmatpush.xpose.msk.msra.mxu1 %vm800_vm0, %v1439_v52  ;;  %v1189_v27 = vpop.f32.mrf.mxu3 }
 0x59c   : > { %v1693_v54 = vpop.permute.xlu0 %1692 }
 0x59d   : > { %2163 = vmatpush.xpose.msk.msra.mxu2 %vm800_vm0, %v1693_v54  ;;  %2137 = vmatpush.xpose.msk.msra.mxu1 %vm800_vm0, %v1437_v53 }
 0x5a1   : > { %2164 = vmatpush.xpose.msk.msra.mxu2 %vm800_vm0, %v1691_v55 }
 0x5a4   : > { %v1435_v8 = vpop.permute.xlu0 %1434 }
 0x5a5   : > { %2165 = vmatpush.xpose.msk.msra.mxu2 %vm800_vm0, %v1689_v56  ;;  %2138 = vmatpush.xpose.msk.msra.mxu1 %vm800_vm0, %v1435_v8 }
 0x5a9   : > { %2139 = vmatpush.xpose.msk.msra.mxu1 %vm800_vm0, %v1433_v59 }
 0x5ac   : > { %v1687_v58 = vpop.permute.xlu0 %1686 }
 0x5ad   : > { %2166 = vmatpush.xpose.msk.msra.mxu2 %vm800_vm0, %v1687_v58  ;;  %v1648_v16 = vpop.f32.mrf.mxu2  ;;  %2140 = vmatpush.xpose.msk.msra.mxu1 %vm800_vm0, %v1431_v61 }
 0x5b0   : > { %2167 = vmatmul.msk.f32.vlgmr.msra.gmra.mxu2 %vm800_vm0, %v1648_v16 }
 0x5ce   : > { %v1651_v62 = vpop.f32.mrf.mxu2 }
 0x5cf   : > { %2168 = vmatmul.msk.f32.gmra.mxu2 %vm800_vm0, %v1651_v62 }
 0x5dd   : > { %v1392_v15 = vpop.f32.mrf.mxu3 }
 0x5de   : > { %2141 = vmatmul.msk.f32.vlgmr.msra.gmra.mxu1 %vm800_vm0, %v1392_v15 }
 0x5e5   : > { %v1395_v46 = vpop.f32.mrf.mxu3 }
 0x5e6   : > { %2142 = vmatmul.msk.f32.gmra.mxu1 %vm800_vm0, %v1395_v46 }
 0x5e7   : > { %2615 = shalt.err (!%p2612_p8)
}
 0x5e8   : > { %s2717_s12 = smov 128   ;;  %s2718_s30 = smov 8   ;;  %v1264_v19 = vadd.f32 %v3218_v12, %v1186_v14  ;;  %v1267_v18 = vadd.f32 %v3222_v13, %v1189_v27 }
 0x5e9   : > { %2208 = dma.vmem_to_hbm [thread:$0]  (%p2869_p3), %s1825_s17, 1024, %s1827_s25, %s1795_s14, %s2717_s12, %s2717_s12, %s2718_s30  }
 0x5ea   : > { %s3560_s19 = sld [smem:[#allocation37_spill]]  ;;  %s2181_s16 = sshll.u32 %s2810_s29, 4 }
 0x5eb   : > { %s653_s6 = scalar_lea.vmem [#allocation16], %s3000_s10  ;;  %s3561_s17 = sld [smem:[#allocation38_spill]] }
 0x5ec   : > { %s1807_s14 = sshll.u32 %s653_s6, 4  ;;  %s1790_s29 = scalar_lea.sflag [#allocation4], %s2997_s4  ;;  %s1808_s14 = int_to_ptr.vmem [resolvable:$true] %s1807_s14 }
 0x5f0   : > { %v2315_v7 = vld [vmem:[%s3560_s19] ss:$0 sm:$0xff] }
 0x5f1   : > { %s1806_s25 = scalar_lea.hbm %s3561_s17, %s2181_s16  ;;  %s2636_s22 = scalar_lea.hbm %s3561_s17, 32 }
 0x5f2   : > { %s1809_s8 = sshll.u32 %s1806_s25, 4  ;;  %s1810_s8 = int_to_ptr.hbm [resolvable:$true] %s1809_s8 }
 0x5f3   : > { %s2630_s11 = sshra.s32 %s1810_s8, 4  ;;  %s2631_s11 = int_to_ptr.hbm [resolvable:$true] %s2630_s11 }
 0x5f4   : > { %s2632_s10 = scalar_lea.hbm %s2631_s11, 16  ;;  %p2637_p5 = scmp.lt.s32.totalorder %s2631_s11, %s3561_s17 }
 0x5f5   : > { %p2633_p9 = scmp.ne.s32.totalorder %s2631_s11, %s2632_s10  ;;  %p2638_p7 = scmp.lt.s32.totalorder %s2636_s22, %s2632_s10 }
 0x5f7   : > { %p2634_p12 = pnand %p2633_p9, %p2869_p3  ;;  %p2639_p4 = por %p2638_p7, %p2637_p5 }
 0x5f9   : > { %p2635_p0 = pneg %p2634_p12 }
 0x5fb   : > { %p2640_p1 = pnand %p2639_p4, %p2635_p0 }
 0x633   : > { %v1773_v9 = vpop.f32.mrf.mxu2 }
 0x652   : > { %v1776_v21 = vpop.f32.mrf.mxu2 }
 0x65b   : > { %v1517_v57 = vpop.f32.mrf.mxu1 }
 0x65c   : > { %v1523_v0 = vadd.f32 %v1517_v57, %v1264_v19 }
 0x65e   : > { %v1779_v11 = vadd.f32 %v1773_v9, %v1523_v0 }
 0x660   : > { %v1785_v17 = vadd.f32 %v2315_v7, %v1779_v11 }
 0x662   : > { %1787 = vst [vmem:[%s653_s6] sm:$0xff] %v1785_v17 }
 0x663   : > { %v1520_v12 = vpop.f32.mrf.mxu1 }
 0x664   : > { %v1524_v60 = vadd.f32 %v1520_v12, %v1267_v18 }
 0x666   : > { %v1780_v20 = vadd.f32 %v1776_v21, %v1524_v60 }
 0x668   : > { %v1786_v23 = vadd.f32 %v2315_v7, %v1780_v20 }
 0x66a   : > { %1788 = vst [vmem:[%s653_s6 + $0x8] sm:$0xff] %v1786_v23 }
 0x66b   : > { %2643 = shalt.err (!%p2640_p1)
}
 0x66c   : > { %2207 = dma.vmem_to_hbm [thread:$0]  (%p2869_p3), %s1808_s14, 256, %s1810_s8, %s1790_s29, %s2717_s12, %s2717_s12, %s2718_s30  }
 0x66d PF: > { %s3562_s4 = sld [smem:[#allocation27_spill]]  ;;  %p3564_p11 = scmp.ge.s32.totalorder %s2706_s28, 2 }
 0x66f   : > { %p2238_p2 = pnand %p3564_p11, %p2824_p6 }
 0x671   : > { %p2239_p10 = pneg %p2238_p2 }
 0x673   : > { %s1841_s16 = sand.u32 1, %s3562_s4  }
 0x674   : > { %s1842_s6 = scalar_lea.sflag [#allocation4], %s1841_s16 }
 0x675   : > { %2685 = dma.done.wait (%p2239_p10), %s1842_s6, 256  }
 0x676   : > { %2687 = vsyncadd (%p2239_p10), %s1842_s6, 4294967040  ;;  %s1852_s23 = scalar_lea.sflag [#allocation18], %s1841_s16 }
 0x677   : > { %2689 = dma.done.wait (%p2239_p10), %s1852_s23, 1024  }
 0x678   : > { %2691 = vsyncadd (%p2239_p10), %s1852_s23, 4294966272  ;;  %s3565_s28 = sld [smem:[#allocation29_spill]]  ;;  %s3567_s25 = smov %s2698_s26 }
 0x679   : > { %s3566_s21 = sld [smem:[#allocation31_spill]]  ;;  %s3568_s26 = smov %s2702_s27 }
 0x67e   : > { %p38_p3 = scmp.ge.s32.totalorder %s3565_s28, 4  }
 0x67f   : > { %s3569_s27 = smov %s3566_s21 }
 0x680   :  { %40 = sbr.rel (!%p38_p3) target bundleno = 22 (0x16), region = 186 }
 0x685   :  { %1858 = vsyncpa [#allocation3], 1 }
 0x686   :  { %1860 = vsyncpa [#allocation3 + $0x1], 1 }
 0x687   :  { %1861 = vsyncpa [#allocation6], 1 }
 0x688   :  { %1863 = vsyncpa [#allocation6 + $0x1], 1 }
 0x689   :  { %1864 = vsyncpa [#allocation9], 1 }
 0x68a   :  { %1866 = vsyncpa [#allocation9 + $0x1], 1 }
 0x68b   :  { %1867 = vsyncpa [#allocation12], 1 }
 0x68c   :  { %1868 = vsyncpa [#allocation15], 1 }
 0x68d   :  { %1869 = vsyncpa [#allocation4], 1 }
 0x68e   :  { %1871 = vsyncpa [#allocation4 + $0x1], 1 }
 0x68f   :  { %1872 = vsyncpa [#allocation18], 1 }
 0x690   :  { %1874 = vsyncpa [#allocation18 + $0x1], 1 }

</bundles_post_ra>
